<compile_context>
chip_gen: v6e
topology: v6e:2x2x1
jax: 0.10.0
libtpu: 0.0.40
codegen_flags: <defaults>
</compile_context>

<pallas_src>
import functools

import numpy as np
import jax
import jax.numpy as jnp
from jax import lax
from jax.experimental import pallas as pl
from jax.experimental.pallas import tpu as pltpu


# --------------------------------------------------------------------------
# Kernel 1: per-batch conv (K-accumulation) + per-batch BN partial statistics
# --------------------------------------------------------------------------
def _conv_stats_kernel_factory(KH, KW, stride, padding, H, W, Ho, Wo,
                               compute_dtype):
    Hp, Wp = H + 2 * padding, W + 2 * padding
    M = Ho * Wo

    def kernel(x_ref, w_ref, conv_ref, stat_ref, *scratch):
        # x_ref:    [Cin, H, W]          one batch element (NCHW slice)
        # w_ref:    [KH, Cout, KW*Cin]   weights grouped per kernel row
        # conv_ref: [Cout, Ho*Wo]        f32 conv output, lane-dense
        # stat_ref: [Cout, 2]            per-batch (sum, centered M2)
        # scratch:  ([Cin, Hp, Wp] compute_dtype VMEM) iff padding > 0
        Cin = x_ref.shape[0]
        Cout = w_ref.shape[1]

        if padding > 0:
            xpad = scratch[0]
            # zero only the halo strips; the interior is fully overwritten below
            zrow = jnp.zeros((Cin, padding, Wp), compute_dtype)
            zcol = jnp.zeros((Cin, H, padding), compute_dtype)
            xpad[:, :padding, :] = zrow
            xpad[:, H + padding:, :] = zrow
            xpad[:, padding:H + padding, :padding] = zcol
            xpad[:, padding:H + padding, W + padding:] = zcol
            xpad[:, padding:H + padding, padding:W + padding] = (
                x_ref[...].astype(compute_dtype))
            src = xpad
        else:
            src = x_ref

        # ---- K-accumulation: one MXU dot per kernel row (K = KW*Cin) ----
        acc = jnp.zeros((Cout, M), jnp.float32)
        for kh in range(KH):
            taps = []
            for kw in range(KW):
                if stride == 1:
                    t = src[:, kh:kh + Ho, kw:kw + Wo]
                else:
                    # strided selection at the Ref level: no oversized load
                    t = src[:, pl.ds(kh, Ho, stride=stride),
                            pl.ds(kw, Wo, stride=stride)]
                taps.append(t.astype(compute_dtype).reshape(Cin, M))
            slab = taps[0] if KW == 1 else jnp.concatenate(taps, axis=0)
            acc = acc + lax.dot_general(
                w_ref[kh].astype(compute_dtype), slab,
                dimension_numbers=(((1,), (0,)), ((), ())),
                preferred_element_type=jnp.float32)

        conv_ref[...] = acc

        # ---- per-batch BN partials: sum and mean-centered M2 (stable merge) ----
        inv_m = 1.0 / float(M)
        ch_sum = jnp.sum(acc, axis=1, keepdims=True)              # [Cout, 1]
        centered = acc - ch_sum * inv_m
        ch_m2 = jnp.sum(centered * centered, axis=1, keepdims=True)
        stat_ref[...] = jnp.concatenate([ch_sum, ch_m2], axis=1)  # [Cout, 2]

    return kernel


# --------------------------------------------------------------------------
# Kernel 2: normalize + ReLU (per batch element, lane-dense rows)
# --------------------------------------------------------------------------
def _bn_relu_kernel(conv_ref, scale_ref, shift_ref, o_ref):
    # conv_ref: [Cout, Ho*Wo] f32;  scale/shift: [Cout, 1];  o_ref: [Cout, Ho*Wo]
    y = conv_ref[...] * scale_ref[...] + shift_ref[...]
    o_ref[...] = jnp.maximum(y, 0.0).astype(o_ref.dtype)


# --------------------------------------------------------------------------
# VMEM budgeting: actual (8,128)-padded tile bytes, double-buffered, capped
# --------------------------------------------------------------------------
def _round_up(x, m):
    return -(-x // m) * m


def _tile_vmem_bytes(shape, dtype):
    dims = list(shape)
    if len(dims) >= 1:
        dims[-1] = _round_up(dims[-1], 128)
    if len(dims) >= 2:
        dims[-2] = _round_up(dims[-2], 8)
    n = 1
    for d in dims:
        n *= d
    return n * np.dtype(dtype).itemsize


def _vmem_limit(tile_specs, scratch_specs):
    need = 2 * sum(_tile_vmem_bytes(s, d) for s, d in tile_specs)   # double buffer
    need += sum(_tile_vmem_bytes(s, d) for s, d in scratch_specs)
    try:
        cap = int(pltpu.get_tpu_info().vmem_capacity_bytes * 0.85)
    except Exception:
        cap = 54 * 1024 * 1024   # conservative: v7x has 64 MiB VMEM per core
    return int(min(cap, max(int(need * 1.5), 4 * 1024 * 1024)))


# --------------------------------------------------------------------------
# Wrapper
# --------------------------------------------------------------------------
def basic_conv2d(x_nchw, weight_oihw, gamma, beta, *, stride=1, padding=0,
                 eps=1e-5, compute_dtype=jnp.float32):
    """Fused Conv2d(bias=False) + BatchNorm2d(training batch stats) + ReLU.

    NCHW in / NCHW out, matching PyTorch BasicConv2d.forward.
    compute_dtype=jnp.bfloat16 feeds the MXU natively on v6e/v7x (accumulation
    stays f32); the default f32 keeps exact parity with the f32 PyTorch module.
    """
    N, Cin, H, W = x_nchw.shape
    Cout, _, KH, KW = weight_oihw.shape
    Ho = (H + 2 * padding - KH) // stride + 1
    Wo = (W + 2 * padding - KW) // stride + 1
    Hp, Wp = H + 2 * padding, W + 2 * padding
    M = Ho * Wo

    # weights grouped per kernel row: [KH, Cout, KW*Cin] (kw-major, ci-minor)
    w_r = jnp.transpose(weight_oihw, (2, 0, 3, 1)).reshape(
        KH, Cout, KW * Cin).astype(compute_dtype)

    conv_kernel = _conv_stats_kernel_factory(
        KH, KW, stride, padding, H, W, Ho, Wo, compute_dtype)

    scratch_shapes = []
    scratch_specs = []
    if padding > 0:
        scratch_shapes.append(pltpu.VMEM((Cin, Hp, Wp), compute_dtype))
        scratch_specs.append(((Cin, Hp, Wp), compute_dtype))

    vmem1 = _vmem_limit(
        [((Cin, H, W), x_nchw.dtype), ((KH, Cout, KW * Cin), compute_dtype),
         ((Cout, M), jnp.float32), ((Cout, 2), jnp.float32)],
        scratch_specs)

    conv_out, stats = pl.pallas_call(
        conv_kernel,
        grid=(N,),
        in_specs=[
            pl.BlockSpec((None, Cin, H, W), lambda n: (n, 0, 0, 0)),
            pl.BlockSpec((KH, Cout, KW * Cin), lambda n: (0, 0, 0)),
        ],
        out_specs=[
            pl.BlockSpec((None, Cout, M), lambda n: (n, 0, 0)),
            pl.BlockSpec((None, Cout, 2), lambda n: (n, 0, 0)),
        ],
        out_shape=[
            jax.ShapeDtypeStruct((N, Cout, M), jnp.float32),
            jax.ShapeDtypeStruct((N, Cout, 2), jnp.float32),
        ],
        scratch_shapes=scratch_shapes,
        compiler_params=pltpu.CompilerParams(
            dimension_semantics=("parallel",),
            vmem_limit_bytes=vmem1),
    )(x_nchw, w_r)

    # ---- global BN statistics: stable merge of per-batch partials, O(N*Cout) ----
    cnt = float(M)
    total = float(N * M)
    sums = stats[:, :, 0]                                # [N, Cout]
    m2s = stats[:, :, 1]                                 # [N, Cout]
    mean = jnp.sum(sums, axis=0) / total                 # [Cout]
    delta = sums / cnt - mean[None, :]
    m2 = jnp.sum(m2s, axis=0) + cnt * jnp.sum(delta * delta, axis=0)
    var = m2 / total                                     # biased var (BN training)
    inv_std = lax.rsqrt(var + eps)
    scale_vec = gamma.astype(jnp.float32) * inv_std
    shift_vec = beta.astype(jnp.float32) - mean * scale_vec
    scale = scale_vec.reshape(Cout, 1)
    shift = shift_vec.reshape(Cout, 1)
    # TODO(synk): PyTorch BatchNorm2d training also updates running_mean /
    # running_var (unbiased) as a module side effect; only the forward
    # activation is produced here.

    vmem2 = _vmem_limit(
        [((Cout, M), jnp.float32), ((Cout, 1), jnp.float32),
         ((Cout, 1), jnp.float32), ((Cout, M), x_nchw.dtype)], [])

    out3 = pl.pallas_call(
        _bn_relu_kernel,
        grid=(N,),
        in_specs=[
            pl.BlockSpec((None, Cout, M), lambda n: (n, 0, 0)),
            pl.BlockSpec((Cout, 1), lambda n: (0, 0)),
            pl.BlockSpec((Cout, 1), lambda n: (0, 0)),
        ],
        out_specs=pl.BlockSpec((None, Cout, M), lambda n: (n, 0, 0)),
        out_shape=jax.ShapeDtypeStruct((N, Cout, M), x_nchw.dtype),
        compiler_params=pltpu.CompilerParams(
            dimension_semantics=("parallel",),
            vmem_limit_bytes=vmem2),
    )(conv_out, scale, shift)

    return out3.reshape(N, Cout, Ho, Wo)     # free reshape; NCHW out


# --------------------------------------------------------------------------
# Pure-JAX reference (PyTorch BasicConv2d forward, training-mode BN)
# --------------------------------------------------------------------------
def _reference(x_nchw, weight_oihw, gamma, beta, *, stride, padding, eps):
    conv = lax.conv_general_dilated(
        x_nchw.astype(jnp.float32), weight_oihw.astype(jnp.float32),
        window_strides=(stride, stride),
        padding=[(padding, padding), (padding, padding)],
        dimension_numbers=("NCHW", "OIHW", "NCHW"))
    mean = jnp.mean(conv, axis=(0, 2, 3), keepdims=True)
    var = jnp.mean((conv - mean) ** 2, axis=(0, 2, 3), keepdims=True)
    y = (conv - mean) * lax.rsqrt(var + eps)
    y = y * gamma.reshape(1, -1, 1, 1) + beta.reshape(1, -1, 1, 1)
    return jnp.maximum(y, 0.0)


if __name__ == "__main__":
    # BasicConv2d(in_channels=4, out_channels=8, kernel_size=3, stride=1, padding=1)
    N, Cin, H, W = 2, 4, 16, 16
    Cout, K, stride, padding = 8, 3, 1, 1

    key = jax.random.PRNGKey(0)
    kx, kw = jax.random.split(key)
    x = jax.random.normal(kx, (N, Cin, H, W), dtype=jnp.float32)
    weight = jax.random.normal(kw, (Cout, Cin, K, K), dtype=jnp.float32) * 0.1
    gamma = jnp.ones((Cout,), jnp.float32)    # BatchNorm2d default init
    beta = jnp.zeros((Cout,), jnp.float32)

    fused = jax.jit(functools.partial(basic_conv2d, stride=stride,
                                      padding=padding))
    out = jax.block_until_ready(fused(x, weight, gamma, beta))

    ref = _reference(x, weight, gamma, beta, stride=stride, padding=padding,
                     eps=1e-5)
    assert out.shape == (N, Cout, H, W)
    assert jnp.allclose(out, ref, rtol=1e-4, atol=1e-4)

    print("KERNEL_OK")
</pallas_src>

<mosaic_0001>
module attributes {stable_mosaic.version = 11 : i64} {
  func.func @kernel(%arg0: i32, %arg1: memref<1x4x16x16xf32, #tpu.memory_space<vmem>>, %arg2: memref<3x8x12xf32, #tpu.memory_space<vmem>>, %arg3: memref<1x8x256xf32, #tpu.memory_space<vmem>>, %arg4: memref<1x8x2xf32, #tpu.memory_space<vmem>>, %arg5: memref<4x18x18xf32, #tpu.memory_space<vmem>>) attributes {dimension_semantics = [#tpu.dimension_semantics<parallel>], iteration_bounds = array<i64: 2>, scalar_prefetch = 0 : i64, scratch_operands = 1 : i64, tpu.core_type = #tpu.core_type<tc>, window_params = [{transform_indices = @transform_0, window_bounds = array<i64: 1, 4, 16, 16>}, {pipeline_mode = #tpu.pipeline_mode<synchronous>, transform_indices = @transform_1, window_bounds = array<i64: 3, 8, 12>}, {transform_indices = @transform_2, window_bounds = array<i64: 1, 8, 256>}, {transform_indices = @transform_3, window_bounds = array<i64: 1, 8, 2>}]} {
    %cst = arith.constant 0.000000e+00 : f32
    %0 = vector.broadcast %cst : f32 to vector<4x1x18xf32>
    %cst_0 = arith.constant 0.000000e+00 : f32
    %1 = vector.broadcast %cst_0 : f32 to vector<4x16x1xf32>
    %c0 = arith.constant 0 : index
    %c0_1 = arith.constant 0 : index
    %c0_2 = arith.constant 0 : index
    %2 = vector.load %arg5[%c0, %c0_1, %c0_2] : memref<4x18x18xf32, #tpu.memory_space<vmem>>, vector<4x1x18xf32>
    tpu.vector_store %arg5[%c0, %c0_1, %c0_2], %0 {strides = array<i32>} : memref<4x18x18xf32, #tpu.memory_space<vmem>>, vector<4x1x18xf32>,
    %c0_3 = arith.constant 0 : index
    %c17 = arith.constant 17 : index
    %c0_4 = arith.constant 0 : index
    %3 = vector.load %arg5[%c0_3, %c17, %c0_4] : memref<4x18x18xf32, #tpu.memory_space<vmem>>, vector<4x1x18xf32>
    tpu.vector_store %arg5[%c0_3, %c17, %c0_4], %0 {strides = array<i32>} : memref<4x18x18xf32, #tpu.memory_space<vmem>>, vector<4x1x18xf32>,
    %c0_5 = arith.constant 0 : index
    %c1 = arith.constant 1 : index
    %c0_6 = arith.constant 0 : index
    %4 = vector.load %arg5[%c0_5, %c1, %c0_6] : memref<4x18x18xf32, #tpu.memory_space<vmem>>, vector<4x16x1xf32>
    tpu.vector_store %arg5[%c0_5, %c1, %c0_6], %1 {strides = array<i32>} : memref<4x18x18xf32, #tpu.memory_space<vmem>>, vector<4x16x1xf32>,
    %c0_7 = arith.constant 0 : index
    %c1_8 = arith.constant 1 : index
    %c17_9 = arith.constant 17 : index
    %5 = vector.load %arg5[%c0_7, %c1_8, %c17_9] : memref<4x18x18xf32, #tpu.memory_space<vmem>>, vector<4x16x1xf32>
    tpu.vector_store %arg5[%c0_7, %c1_8, %c17_9], %1 {strides = array<i32>} : memref<4x18x18xf32, #tpu.memory_space<vmem>>, vector<4x16x1xf32>,
    %c0_10 = arith.constant 0 : index
    %c0_11 = arith.constant 0 : index
    %c0_12 = arith.constant 0 : index
    %c0_13 = arith.constant 0 : index
    %6 = vector.load %arg1[%c0_10, %c0_11, %c0_12, %c0_13] : memref<1x4x16x16xf32, #tpu.memory_space<vmem>>, vector<1x4x16x16xf32>
    %7 = vector.shape_cast %6 : vector<1x4x16x16xf32> to vector<4x16x16xf32>
    %c0_14 = arith.constant 0 : index
    %c1_15 = arith.constant 1 : index
    %c1_16 = arith.constant 1 : index
    %8 = vector.load %arg5[%c0_14, %c1_15, %c1_16] : memref<4x18x18xf32, #tpu.memory_space<vmem>>, vector<4x16x16xf32>
    tpu.vector_store %arg5[%c0_14, %c1_15, %c1_16], %7 {strides = array<i32>} : memref<4x18x18xf32, #tpu.memory_space<vmem>>, vector<4x16x16xf32>,
    %cst_17 = arith.constant 0.000000e+00 : f32
    %9 = vector.broadcast %cst_17 : f32 to vector<8x256xf32>
    %c0_18 = arith.constant 0 : index
    %c0_19 = arith.constant 0 : index
    %c0_20 = arith.constant 0 : index
    %10 = vector.load %arg5[%c0_18, %c0_19, %c0_20] : memref<4x18x18xf32, #tpu.memory_space<vmem>>, vector<4x16x16xf32>
    %11 = vector.shape_cast %10 : vector<4x16x16xf32> to vector<4x256xf32>
    %c0_21 = arith.constant 0 : index
    %c0_22 = arith.constant 0 : index
    %c1_23 = arith.constant 1 : index
    %12 = vector.load %arg5[%c0_21, %c0_22, %c1_23] : memref<4x18x18xf32, #tpu.memory_space<vmem>>, vector<4x16x16xf32>
    %13 = vector.shape_cast %12 : vector<4x16x16xf32> to vector<4x256xf32>
    %c0_24 = arith.constant 0 : index
    %c0_25 = arith.constant 0 : index
    %c2 = arith.constant 2 : index
    %14 = vector.load %arg5[%c0_24, %c0_25, %c2] : memref<4x18x18xf32, #tpu.memory_space<vmem>>, vector<4x16x16xf32>
    %15 = vector.shape_cast %14 : vector<4x16x16xf32> to vector<4x256xf32>
    %16 = tpu.concatenate %11, %13, %15 in 0 : vector<4x256xf32>, vector<4x256xf32>, vector<4x256xf32> -> vector<12x256xf32>
    %c0_26 = arith.constant 0 : index
    %c0_27 = arith.constant 0 : index
    %c0_28 = arith.constant 0 : index
    %17 = vector.load %arg2[%c0_26, %c0_27, %c0_28] : memref<3x8x12xf32, #tpu.memory_space<vmem>>, vector<1x8x12xf32>
    %18 = vector.shape_cast %17 : vector<1x8x12xf32> to vector<8x12xf32>
    %cst_29 = arith.constant dense<0.000000e+00> : vector<8x256xf32>
    %19 = tpu.matmul %18, %16, %cst_29 {dimension_numbers = #tpu.dot_dimension_numbers<[1], [0], [0], [1], [0, 0, 1, 1], [], []>} : vector<8x12xf32>, vector<12x256xf32>, vector<8x256xf32> -> vector<8x256xf32>
    %20 = arith.addf %9, %19 : vector<8x256xf32>
    %c0_30 = arith.constant 0 : index
    %c1_31 = arith.constant 1 : index
    %c0_32 = arith.constant 0 : index
    %21 = vector.load %arg5[%c0_30, %c1_31, %c0_32] : memref<4x18x18xf32, #tpu.memory_space<vmem>>, vector<4x16x16xf32>
    %22 = vector.shape_cast %21 : vector<4x16x16xf32> to vector<4x256xf32>
    %c0_33 = arith.constant 0 : index
    %c1_34 = arith.constant 1 : index
    %c1_35 = arith.constant 1 : index
    %23 = vector.load %arg5[%c0_33, %c1_34, %c1_35] : memref<4x18x18xf32, #tpu.memory_space<vmem>>, vector<4x16x16xf32>
    %24 = vector.shape_cast %23 : vector<4x16x16xf32> to vector<4x256xf32>
    %c0_36 = arith.constant 0 : index
    %c1_37 = arith.constant 1 : index
    %c2_38 = arith.constant 2 : index
    %25 = vector.load %arg5[%c0_36, %c1_37, %c2_38] : memref<4x18x18xf32, #tpu.memory_space<vmem>>, vector<4x16x16xf32>
    %26 = vector.shape_cast %25 : vector<4x16x16xf32> to vector<4x256xf32>
    %27 = tpu.concatenate %22, %24, %26 in 0 : vector<4x256xf32>, vector<4x256xf32>, vector<4x256xf32> -> vector<12x256xf32>
    %c1_39 = arith.constant 1 : index
    %c0_40 = arith.constant 0 : index
    %c0_41 = arith.constant 0 : index
    %28 = vector.load %arg2[%c1_39, %c0_40, %c0_41] : memref<3x8x12xf32, #tpu.memory_space<vmem>>, vector<1x8x12xf32>
    %29 = vector.shape_cast %28 : vector<1x8x12xf32> to vector<8x12xf32>
    %cst_42 = arith.constant dense<0.000000e+00> : vector<8x256xf32>
    %30 = tpu.matmul %29, %27, %cst_42 {dimension_numbers = #tpu.dot_dimension_numbers<[1], [0], [0], [1], [0, 0, 1, 1], [], []>} : vector<8x12xf32>, vector<12x256xf32>, vector<8x256xf32> -> vector<8x256xf32>
    %31 = arith.addf %20, %30 : vector<8x256xf32>
    %c0_43 = arith.constant 0 : index
    %c2_44 = arith.constant 2 : index
    %c0_45 = arith.constant 0 : index
    %32 = vector.load %arg5[%c0_43, %c2_44, %c0_45] : memref<4x18x18xf32, #tpu.memory_space<vmem>>, vector<4x16x16xf32>
    %33 = vector.shape_cast %32 : vector<4x16x16xf32> to vector<4x256xf32>
    %c0_46 = arith.constant 0 : index
    %c2_47 = arith.constant 2 : index
    %c1_48 = arith.constant 1 : index
    %34 = vector.load %arg5[%c0_46, %c2_47, %c1_48] : memref<4x18x18xf32, #tpu.memory_space<vmem>>, vector<4x16x16xf32>
    %35 = vector.shape_cast %34 : vector<4x16x16xf32> to vector<4x256xf32>
    %c0_49 = arith.constant 0 : index
    %c2_50 = arith.constant 2 : index
    %c2_51 = arith.constant 2 : index
    %36 = vector.load %arg5[%c0_49, %c2_50, %c2_51] : memref<4x18x18xf32, #tpu.memory_space<vmem>>, vector<4x16x16xf32>
    %37 = vector.shape_cast %36 : vector<4x16x16xf32> to vector<4x256xf32>
    %38 = tpu.concatenate %33, %35, %37 in 0 : vector<4x256xf32>, vector<4x256xf32>, vector<4x256xf32> -> vector<12x256xf32>
    %c2_52 = arith.constant 2 : index
    %c0_53 = arith.constant 0 : index
    %c0_54 = arith.constant 0 : index
    %39 = vector.load %arg2[%c2_52, %c0_53, %c0_54] : memref<3x8x12xf32, #tpu.memory_space<vmem>>, vector<1x8x12xf32>
    %40 = vector.shape_cast %39 : vector<1x8x12xf32> to vector<8x12xf32>
    %cst_55 = arith.constant dense<0.000000e+00> : vector<8x256xf32>
    %41 = tpu.matmul %40, %38, %cst_55 {dimension_numbers = #tpu.dot_dimension_numbers<[1], [0], [0], [1], [0, 0, 1, 1], [], []>} : vector<8x12xf32>, vector<12x256xf32>, vector<8x256xf32> -> vector<8x256xf32>
    %42 = arith.addf %31, %41 : vector<8x256xf32>
    %c0_56 = arith.constant 0 : index
    %c0_57 = arith.constant 0 : index
    %c0_58 = arith.constant 0 : index
    %43 = vector.load %arg3[%c0_56, %c0_57, %c0_58] : memref<1x8x256xf32, #tpu.memory_space<vmem>>, vector<1x8x256xf32>
    %44 = vector.shape_cast %43 : vector<1x8x256xf32> to vector<8x256xf32>
    %45 = vector.shape_cast %42 : vector<8x256xf32> to vector<1x8x256xf32>
    tpu.vector_store %arg3[%c0_56, %c0_57, %c0_58], %45 {strides = array<i32>} : memref<1x8x256xf32, #tpu.memory_space<vmem>>, vector<1x8x256xf32>,
    %cst_59 = arith.constant dense<0.000000e+00> : vector<8xf32>
    %46 = vector.multi_reduction <add>, %42, %cst_59 [1] : vector<8x256xf32> to vector<8xf32>
    %47 = vector.shape_cast %46 : vector<8xf32> to vector<8x1xf32>
    %cst_60 = arith.constant 3.906250e-03 : f32
    %48 = vector.broadcast %cst_60 : f32 to vector<8x1xf32>
    %49 = arith.mulf %47, %48 : vector<8x1xf32>
    %50 = vector.broadcast %49 : vector<8x1xf32> to vector<8x256xf32>
    %51 = arith.subf %42, %50 : vector<8x256xf32>
    %52 = arith.mulf %51, %51 : vector<8x256xf32>
    %cst_61 = arith.constant dense<0.000000e+00> : vector<8xf32>
    %53 = vector.multi_reduction <add>, %52, %cst_61 [1] : vector<8x256xf32> to vector<8xf32>
    %54 = vector.shape_cast %53 : vector<8xf32> to vector<8x1xf32>
    %55 = tpu.concatenate %47, %54 in 1 : vector<8x1xf32>, vector<8x1xf32> -> vector<8x2xf32>
    %c0_62 = arith.constant 0 : index
    %c0_63 = arith.constant 0 : index
    %c0_64 = arith.constant 0 : index
    %56 = vector.load %arg4[%c0_62, %c0_63, %c0_64] : memref<1x8x2xf32, #tpu.memory_space<vmem>>, vector<1x8x2xf32>
    %57 = vector.shape_cast %56 : vector<1x8x2xf32> to vector<8x2xf32>
    %58 = vector.shape_cast %55 : vector<8x2xf32> to vector<1x8x2xf32>
    tpu.vector_store %arg4[%c0_62, %c0_63, %c0_64], %58 {strides = array<i32>} : memref<1x8x2xf32, #tpu.memory_space<vmem>>, vector<1x8x2xf32>,
    return
  }
  func.func @transform_0(%arg0: i32) -> (i32, i32, i32, i32) {
    %c0_i32 = arith.constant 0 : i32
    %c0_i32_0 = arith.constant 0 : i32
    %c0_i32_1 = arith.constant 0 : i32
    %c0_i32_2 = arith.constant 0 : i32
    return %arg0, %c0_i32, %c0_i32_0, %c0_i32_1 : i32, i32, i32, i32
  }
  func.func @transform_1(%arg0: i32) -> (i32, i32, i32) {
    %c0_i32 = arith.constant 0 : i32
    %c0_i32_0 = arith.constant 0 : i32
    %c0_i32_1 = arith.constant 0 : i32
    %c0_i32_2 = arith.constant 0 : i32
    return %c0_i32, %c0_i32_0, %c0_i32_1 : i32, i32, i32
  }
  func.func @transform_2(%arg0: i32) -> (i32, i32, i32) {
    %c0_i32 = arith.constant 0 : i32
    %c0_i32_0 = arith.constant 0 : i32
    %c0_i32_1 = arith.constant 0 : i32
    return %arg0, %c0_i32, %c0_i32_0 : i32, i32, i32
  }
  func.func @transform_3(%arg0: i32) -> (i32, i32, i32) {
    %c0_i32 = arith.constant 0 : i32
    %c0_i32_0 = arith.constant 0 : i32
    %c0_i32_1 = arith.constant 0 : i32
    return %arg0, %c0_i32, %c0_i32_0 : i32, i32, i32
  }
}

module attributes {stable_mosaic.version = 11 : i64} {
  func.func @_bn_relu_kernel(%arg0: i32, %arg1: memref<1x8x256xf32, #tpu.memory_space<vmem>>, %arg2: memref<8x1xf32, #tpu.memory_space<vmem>>, %arg3: memref<8x1xf32, #tpu.memory_space<vmem>>, %arg4: memref<1x8x256xf32, #tpu.memory_space<vmem>>) attributes {dimension_semantics = [#tpu.dimension_semantics<parallel>], iteration_bounds = array<i64: 2>, scalar_prefetch = 0 : i64, scratch_operands = 0 : i64, tpu.core_type = #tpu.core_type<tc>, window_params = [{transform_indices = @transform_0, window_bounds = array<i64: 1, 8, 256>}, {pipeline_mode = #tpu.pipeline_mode<synchronous>, transform_indices = @transform_1, window_bounds = array<i64: 8, 1>}, {pipeline_mode = #tpu.pipeline_mode<synchronous>, transform_indices = @transform_2, window_bounds = array<i64: 8, 1>}, {transform_indices = @transform_3, window_bounds = array<i64: 1, 8, 256>}]} {
    %c0 = arith.constant 0 : index
    %c0_0 = arith.constant 0 : index
    %c0_1 = arith.constant 0 : index
    %0 = vector.load %arg1[%c0, %c0_0, %c0_1] : memref<1x8x256xf32, #tpu.memory_space<vmem>>, vector<1x8x256xf32>
    %1 = vector.shape_cast %0 : vector<1x8x256xf32> to vector<8x256xf32>
    %c0_2 = arith.constant 0 : index
    %c0_3 = arith.constant 0 : index
    %2 = vector.load %arg2[%c0_2, %c0_3] : memref<8x1xf32, #tpu.memory_space<vmem>>, vector<8x1xf32>
    %3 = vector.broadcast %2 : vector<8x1xf32> to vector<8x256xf32>
    %4 = arith.mulf %1, %3 : vector<8x256xf32>
    %c0_4 = arith.constant 0 : index
    %c0_5 = arith.constant 0 : index
    %5 = vector.load %arg3[%c0_4, %c0_5] : memref<8x1xf32, #tpu.memory_space<vmem>>, vector<8x1xf32>
    %6 = vector.broadcast %5 : vector<8x1xf32> to vector<8x256xf32>
    %7 = arith.addf %4, %6 : vector<8x256xf32>
    %cst = arith.constant 0.000000e+00 : f32
    %8 = vector.broadcast %cst : f32 to vector<8x256xf32>
    %9 = arith.maximumf %7, %8 : vector<8x256xf32>
    %c0_6 = arith.constant 0 : index
    %c0_7 = arith.constant 0 : index
    %c0_8 = arith.constant 0 : index
    %10 = vector.load %arg4[%c0_6, %c0_7, %c0_8] : memref<1x8x256xf32, #tpu.memory_space<vmem>>, vector<1x8x256xf32>
    %11 = vector.shape_cast %10 : vector<1x8x256xf32> to vector<8x256xf32>
    %12 = vector.shape_cast %9 : vector<8x256xf32> to vector<1x8x256xf32>
    tpu.vector_store %arg4[%c0_6, %c0_7, %c0_8], %12 {strides = array<i32>} : memref<1x8x256xf32, #tpu.memory_space<vmem>>, vector<1x8x256xf32>,
    return
  }
  func.func @transform_0(%arg0: i32) -> (i32, i32, i32) {
    %c0_i32 = arith.constant 0 : i32
    %c0_i32_0 = arith.constant 0 : i32
    %c0_i32_1 = arith.constant 0 : i32
    return %arg0, %c0_i32, %c0_i32_0 : i32, i32, i32
  }
  func.func @transform_1(%arg0: i32) -> (i32, i32) {
    %c0_i32 = arith.constant 0 : i32
    %c0_i32_0 = arith.constant 0 : i32
    %c0_i32_1 = arith.constant 0 : i32
    return %c0_i32, %c0_i32_0 : i32, i32
  }
  func.func @transform_2(%arg0: i32) -> (i32, i32) {
    %c0_i32 = arith.constant 0 : i32
    %c0_i32_0 = arith.constant 0 : i32
    %c0_i32_1 = arith.constant 0 : i32
    return %c0_i32, %c0_i32_0 : i32, i32
  }
  func.func @transform_3(%arg0: i32) -> (i32, i32, i32) {
    %c0_i32 = arith.constant 0 : i32
    %c0_i32_0 = arith.constant 0 : i32
    %c0_i32_1 = arith.constant 0 : i32
    return %arg0, %c0_i32, %c0_i32_0 : i32, i32, i32
  }
}

</mosaic_0001>

<bundles_post_ra>
// kernel: basic_conv2d.3
= control target key start
LH: loop header
LB: loop body
LE: loop exit
PB: predicated region body
PF: predicated region fallthrough
CT: control target
= control target key end

     0   :  { %s300_s12 = smov 0   ;;  %s323_s0 = inlined_call_operand.vmem [shape: f32[2,8,256], index: 0, kind: input, shape index: {}]   ;;  %s324_s1 = inlined_call_operand.vmem [shape: f32[8,1], index: 1, kind: input, shape index: {}]   ;;  %s325_s2 = inlined_call_operand.vmem [shape: f32[8,1], index: 2, kind: input, shape index: {}]   ;;  %s326_s3 = inlined_call_operand.vmem [shape: f32[2,8,256], index: 3, kind: output, shape index: {}]  }
   0x1 LB: > { %s248_s13 = sadd.s32 4294967295, %s277_s12   ;;  %p252_p0 = scmp.ge.s32.totalorder %s277_s12, 1  ;;  %s277_s12 = sphi %s300_s12, %s13_s12  }
   0x2   : > { %p137_p1 = scmp.lt.s32.totalorder %s277_s12, 3 }
   0x4   : > { %p138_p2 = pnand %p252_p0, %p137_p1 }
   0x5   : > { %p161_p3 = scmp.lt.s32.totalorder (!%p138_p2), %s248_s13, 1 }
   0x6   : > { %141 = sbr.rel (%p138_p2) target bundleno = 146 (0x92), region = 32 }
   0xb   : > { %v173_v0 = vld [vmem:[%s324_s1] sm:$0xff]  ;;  %v279_v1 = vmov 0   ;;  %s328_s13 = smov (!%p161_p3, %s248_s13), 1 }
   0xc   : > { %270 = vset.pattern.permute.xlu0 %v279_v1  ;;  %v181_v2 = vld [vmem:[%s325_s2] sm:$0xff]  ;;  %s259_s18 = sshll.u32 %s328_s13, 4 }
   0xd   : > { %176 = vperm.xlu0 %270, %v173_v0   ;;  %s165_s21 = scalar_lea.vmem %s323_s0, %s259_s18  ;;  %s170_s24 = scalar_lea.vmem %s326_s3, %s259_s18 }
   0xe   : > { %v171_v4 = vld [vmem:[%s165_s21] sm:$0xff]  ;;  %v172_v5 = vld [vmem:[%s165_s21 + $0x8] sm:$0xff] }
  0x11   : > { %184 = vperm.xlu0 %270, %v181_v2  }
  0x88   : > { %v177_v3 = vpop.permute.xlu0 %176 }
  0x89   : > { %v179_v6 = vmul.f32 %v177_v3, %v171_v4  ;;  %v180_v7 = vmul.f32 %v177_v3, %v172_v5 }
  0x8c   : > { %v185_v8 = vpop.permute.xlu0 %184 }
  0x8d   : > { %v187_v9 = vadd.f32 %v185_v8, %v179_v6  ;;  %v188_v10 = vadd.f32 %v185_v8, %v180_v7 }
  0x8f   : > { %v189_v11 = vmax.f32 %v187_v9, 0.0  ;;  %v190_v12 = vmax.f32 %v188_v10, 0.0 }
  0x91   : > { %191 = vst [vmem:[%s170_s24] sm:$0xff] %v189_v11  ;;  %192 = vst [vmem:[%s170_s24 + $0x8] sm:$0xff] %v190_v12 }
  0x92 PF: > { %s13_s12 = sadd.s32 1, %s277_s12  }
  0x93   : > { %p10_p4 = scmp.ge.s32.totalorder %s13_s12, 4  }
  0x95   :  { %12 = sbr.rel (!%p10_p4) target bundleno = 1 (0x1), region = 62 }

// kernel: basic_conv2d.2
= control target key start
LH: loop header
LB: loop body
LE: loop exit
PB: predicated region body
PF: predicated region fallthrough
CT: control target
= control target key end

     0   :  { %s2801_s12 = smov 0   ;;  %s4359_s0 = inlined_call_operand.vmem [shape: f32[2,4,16,16], index: 0, kind: input, shape index: {}]   ;;  %s4360_s1 = inlined_call_operand.vmem [shape: f32[3,8,12], index: 1, kind: input, shape index: {}]   ;;  %s4361_s2 = inlined_call_operand.vmem [shape: f32[2,8,256], index: 2, kind: output, shape index: {0}]   ;;  %s4362_s3 = inlined_call_operand.vmem [shape: f32[2,8,2], index: 3, kind: output, shape index: {1}]  }
   0x1 LB: > { %s2686_s13 = sadd.s32 4294967295, %s2766_s12   ;;  %p2690_p0 = scmp.ge.s32.totalorder %s2766_s12, 1  ;;  %s2766_s12 = sphi %s2801_s12, %s14_s12  }
   0x2   : > { %p140_p1 = scmp.lt.s32.totalorder %s2766_s12, 3 }
   0x4   : > { %p141_p2 = pnand %p2690_p0, %p140_p1 }
   0x6   : > { %144 = sbr.rel (%p141_p2) target bundleno = 1128 (0x468), region = 28 }
   0xb   : > { %p2809_p3 = scmp.lt.s32.totalorder %s2686_s13, 1  ;;  %vm191_vm0 = vcmask 7168   ;;  %vm200_vm1 = vcmask 146568   ;;  %v4363_v0 = vmov 0.0   ;;  %vm182_vm2 = vcmask 139264   ;;  %s2769_s19 = smov 1  }
   0xc   : > { %197 = vst.msk [vmem:[#allocation2 + $0x39] sm:$0xff] %vm191_vm0, %v4363_v0  ;;  %192 = vst.msk [vmem:[#allocation2 + $0x1] sm:$0xff] %vm191_vm0, %v4363_v0  ;;  %1723 = vmatprep.mubr.f32.mxu0 %v4363_v0  ;;  %1803 = vmatprep.mubr.f32.mxu1 %v4363_v0  ;;  %vm249_vm3 = vcmask 138248   ;;  %v2770_v11 = vmov 1983009808   ;;  %v271_v13 = vlaneseq  ;;  %s2771_s20 = smov 127  }
   0xd   : > { %193 = vst.msk [vmem:[#allocation2 + $0x9] sm:$0xff] %vm191_vm0, %v4363_v0  ;;  %194 = vst.msk [vmem:[#allocation2 + $0x19] sm:$0xff] %vm191_vm0, %v4363_v0  ;;  %s4522_s13 = smov (!%p2809_p3, %s2686_s13), 1  ;;  %v269_v12 = vunpack.c.l.s4 %v2770_v11  ;;  %s2772_s21 = smov 126   ;;  %vm458_vm4 = vcmask 130048   ;;  %vm460_vm5 = vcmask 261120  }
   0xe   : > { %195 = vst.msk [vmem:[#allocation2 + $0x21] sm:$0xff] %vm191_vm0, %v4363_v0  ;;  %196 = vst.msk [vmem:[#allocation2 + $0x31] sm:$0xff] %vm191_vm0, %v4363_v0  ;;  %s2709_s15 = sshll.u32 %s4522_s13, 6  ;;  %v2875_v17 = vshrl.u32 %v271_v13, 7  ;;  %s2774_s22 = smov 32   ;;  %vm462_vm6 = vcmask 392192  }
   0xf   : > { %198 = vst.msk [vmem:[#allocation2 + $0x49] sm:$0xff] %vm191_vm0, %v4363_v0  ;;  %199 = vst.msk [vmem:[#allocation2 + $0x51] sm:$0xff] %vm191_vm0, %v4363_v0  ;;  %s172_s18 = scalar_lea.vmem %s4359_s0, %s2709_s15  ;;  %v270_v16 = vunpack.c.0.s8 %v269_v12  ;;  %s2775_s23 = smov 16   ;;  %vm464_vm7 = vcmask 523264   ;;  %vm466_vm8 = vcmask 654336   ;;  %vm468_vm9 = vcmask 785408  }
  0x10   : > { %206 = vst.msk [vmem:[#allocation2 + $0x39] sm:$0xff] %vm200_vm1, %v4363_v0  ;;  %202 = vst.msk [vmem:[#allocation2 + $0x9] sm:$0xff] %vm200_vm1, %v4363_v0  ;;  %v214_v1 = vld [vmem:[%s172_s18 + $0x28] sm:$0xff]  ;;  %v216_v3 = vld [vmem:[%s172_s18 + $0x38] sm:$0xff]  ;;  %s2776_s24 = smov 64   ;;  %s2777_s25 = smov 48  }
  0x11   : > { %201 = vst.msk [vmem:[#allocation2 + $0x1] sm:$0xff] %vm200_vm1, %v4363_v0  ;;  %203 = vst.msk [vmem:[#allocation2 + $0x19] sm:$0xff] %vm200_vm1, %v4363_v0  ;;  %v210_v2 = vld [vmem:[%s172_s18 + $0x8] sm:$0xff]  ;;  %235 = vrot.lane.b32.xlu1 %v214_v1, %s2769_s19  ;;  %v212_v4 = vld [vmem:[%s172_s18 + $0x18] sm:$0xff]  ;;  %v2894_v26 = vsub.s32 %v270_v16, %v2875_v17  ;;  %s2778_s26 = smov 96   ;;  %s2779_s27 = smov 80  }
  0x12   : > { %204 = vst.msk [vmem:[#allocation2 + $0x21] sm:$0xff] %vm200_vm1, %v4363_v0  ;;  %205 = vst.msk [vmem:[#allocation2 + $0x31] sm:$0xff] %vm200_vm1, %v4363_v0  ;;  %227 = vrot.lane.b32.xlu0 %v210_v2, %s2769_s19  ;;  %v211_v5 = vld [vmem:[%s172_s18 + $0x10] sm:$0xff]  ;;  %v209_v6 = vld [vmem:[%s172_s18] sm:$0xff]  ;;  %s2780_s28 = smov 112   ;;  %vm470_vm10 = vcmask 916480  }
  0x13   : > { %207 = vst.msk [vmem:[#allocation2 + $0x49] sm:$0xff] %vm200_vm1, %v4363_v0  ;;  %208 = vst.msk [vmem:[#allocation2 + $0x51] sm:$0xff] %vm200_vm1, %v4363_v0  ;;  %v215_v7 = vld [vmem:[%s172_s18 + $0x30] sm:$0xff]  ;;  %v213_v8 = vld [vmem:[%s172_s18 + $0x20] sm:$0xff]  ;;  %vm953_vm11 = vcmask 1043456   ;;  %vm1649_vm12 = vcmask 97280  }
  0x14   : > { %183 = vst.msk [vmem:[#allocation2] sm:$0x1] %vm182_vm2, %v4363_v0  ;;  %184 = vst.msk [vmem:[#allocation2 + $0x18] sm:$0x1] %vm182_vm2, %v4363_v0  ;;  %s2710_s8 = sshll.u32 %s4522_s13, 4  ;;  %s2695_s14 = sshll.u32 %s4522_s13, 3 }
  0x15   : > { %185 = vst.msk [vmem:[#allocation2 + $0x30] sm:$0x1] %vm182_vm2, %v4363_v0  ;;  %186 = vst.msk [vmem:[#allocation2 + $0x48] sm:$0x1] %vm182_vm2, %v4363_v0  ;;  %239 = vrot.lane.b32.xlu1 %v216_v3, %s2769_s19  ;;  %s177_s11 = scalar_lea.vmem %s4361_s2, %s2710_s8  ;;  %s181_s17 = scalar_lea.vmem %s4362_s3, %s2695_s14  ;;  %vm2598_vm13 = vcmask 15360  }
  0x16   : > { %187 = vst.msk [vmem:[#allocation2 + $0x11] sm:$0x1] %vm182_vm2, %v4363_v0  ;;  %188 = vst.msk [vmem:[#allocation2 + $0x29] sm:$0x1] %vm182_vm2, %v4363_v0  ;;  %231 = vrot.lane.b32.xlu0 %v212_v4, %s2769_s19 }
  0x17   : > { %189 = vst.msk [vmem:[#allocation2 + $0x41] sm:$0x1] %vm182_vm2, %v4363_v0  ;;  %190 = vst.msk [vmem:[#allocation2 + $0x59] sm:$0x1] %vm182_vm2, %v4363_v0 }
  0x19   : > { %229 = vrot.lane.b32.xlu1 %v211_v5, %s2769_s19 }
  0x1a   : > { %225 = vrot.lane.b32.xlu0 %v209_v6, %s2769_s19 }
  0x1d   : > { %237 = vrot.lane.b32.xlu1 %v215_v7, %s2769_s19 }
  0x1e   : > { %233 = vrot.lane.b32.xlu0 %v213_v8, %s2769_s19 }
  0x83   : > { %v236_v9 = vpop.permute.xlu1 %235 }
  0x84   : > { %v228_v10 = vpop.permute.xlu0 %227  ;;  %255 = vst.msk [vmem:[#allocation2 + $0x39] sm:$0xff] %vm249_vm3, %v236_v9 }
  0x85   : > { %251 = vst.msk [vmem:[#allocation2 + $0x9] sm:$0xff] %vm249_vm3, %v228_v10 }
  0x87   : > { %v240_v14 = vpop.permute.xlu1 %239 }
  0x88   : > { %v232_v15 = vpop.permute.xlu0 %231  ;;  %257 = vst.msk [vmem:[#allocation2 + $0x51] sm:$0xff] %vm249_vm3, %v240_v14 }
  0x89   : > { %253 = vst.msk [vmem:[#allocation2 + $0x21] sm:$0xff] %vm249_vm3, %v232_v15 }
  0x8b   : > { %v230_v18 = vpop.permute.xlu1 %229  ;;  %v2879_v21 = vld [vmem:[#allocation2 + $0x39] sm:$0xff] }
  0x8c   : > { %v226_v19 = vpop.permute.xlu0 %225  ;;  %v2877_v20 = vld [vmem:[#allocation2 + $0x9] sm:$0xff]  ;;  %252 = vst.msk [vmem:[#allocation2 + $0x19] sm:$0xff] %vm249_vm3, %v230_v18  ;;  %v2891_v25 = vld [vmem:[#allocation2 + $0x3a] sm:$0xff] }
  0x8d   : > { %250 = vst.msk [vmem:[#allocation2 + $0x1] sm:$0xff] %vm249_vm3, %v226_v19  ;;  %1181 = vrot.lane.b32.xlu0 %v2877_v20, %s2771_s20  ;;  %v1033_v22 = vcombine.low %v2877_v20, %v2879_v21  ;;  %v1034_v23 = vcombine.high %v2877_v20, %v2879_v21  ;;  %v2889_v24 = vld [vmem:[#allocation2 + $0xa] sm:$0xff] }
  0x8e   : > { %v1886_v32 = vcombine.low %v2889_v24, %v2891_v25 }
  0x8f   : > { %v238_v27 = vpop.permute.xlu1 %237  ;;  %v2896_v30 = vld [vmem:[#allocation2 + $0x51] sm:$0xff]  ;;  %v2914_v37 = vrot.slane %v1033_v22, %v2894_v26  ;;  %v2920_v39 = vrot.slane %v1034_v23, %v2894_v26 }
  0x90   : > { %v234_v28 = vpop.permute.xlu0 %233  ;;  %v960_v29 = vld [vmem:[#allocation2 + $0x21] sm:$0xff]  ;;  %256 = vst.msk [vmem:[#allocation2 + $0x49] sm:$0xff] %vm249_vm3, %v238_v27  ;;  %v2909_v35 = vld [vmem:[#allocation2 + $0x52] sm:$0xff]  ;;  %v2926_v42 = vrot.slane %v1886_v32, %v2894_v26 }
  0x91   : > { %v2898_v31 = vld [vmem:[#allocation2 + $0x22] sm:$0xff]  ;;  %254 = vst.msk [vmem:[#allocation2 + $0x31] sm:$0xff] %vm249_vm3, %v234_v28  ;;  %1185 = vrot.lane.b32.xlu1 %v960_v29, %s2771_s20  ;;  %1189 = vrot.lane.b32.xlu0 %v2879_v21, %s2771_s20  ;;  %v1049_v33 = vcombine.low %v960_v29, %v2896_v30  ;;  %v1050_v34 = vcombine.high %v960_v29, %v2896_v30 }
  0x92   : > { %v1902_v36 = vcombine.low %v2898_v31, %v2909_v35 }
  0x93   : > { %v2917_v38 = vrot.slane %v1049_v33, %v2894_v26  ;;  %v2923_v40 = vrot.slane %v1050_v34, %v2894_v26  ;;  %v959_v47 = vld [vmem:[#allocation2 + $0x19] sm:$0xff] }
  0x94   : > { %v957_v41 = vld [vmem:[#allocation2 + $0x1] sm:$0xff]  ;;  %v2929_v43 = vrot.slane %v1902_v36, %v2894_v26  ;;  %v2946_v53 = vld [vmem:[#allocation2 + $0x18] sm:$0xff] }
  0x95   : > { %1193 = vrot.lane.b32.xlu1 %v2896_v30, %s2771_s20  ;;  %1179 = vrot.lane.b32.xlu0 %v957_v41, %s2771_s20  ;;  %v1066_v44 = vcombine.high %v2914_v37, %v2917_v38  ;;  %v1065_v45 = vcombine.low %v2914_v37, %v2917_v38  ;;  %v1081_v46 = vcombine.low %v2920_v39, %v2923_v40  ;;  %v259_v50 = vld [vmem:[#allocation2 + $0x8] sm:$0xff]  ;;  %v261_v51 = vld [vmem:[#allocation2 + $0x20] sm:$0xff] }
  0x96   : > { %4400 = vst [vmem:[#allocation3_spill] sm:$0xff] %v2929_v43  ;;  %v1082_v48 = vcombine.high %v2920_v39, %v2923_v40  ;;  %v2944_v52 = vld [vmem:[#allocation2] sm:$0xff] }
  0x97   : > { %v963_v55 = vld [vmem:[#allocation2 + $0x49] sm:$0xff]  ;;  %v3056_v33 = vld [vmem:[#allocation2 + $0x1a] sm:$0xff] }
  0x98   : > { %v961_v54 = vld [vmem:[#allocation2 + $0x31] sm:$0xff]  ;;  %v981_v59 = vcombine.low %v959_v47, %v963_v55  ;;  %v2952_v62 = vld [vmem:[#allocation2 + $0x48] sm:$0xff]  ;;  %v982_v63 = vcombine.high %v959_v47, %v963_v55 }
  0x99   : > { %v263_v56 = vld [vmem:[#allocation2 + $0x38] sm:$0xff]  ;;  %1183 = vrot.lane.b32.xlu1 %v959_v47, %s2771_s20  ;;  %1187 = vrot.lane.b32.xlu0 %v961_v54, %s2771_s20  ;;  %v965_v57 = vcombine.low %v957_v41, %v961_v54  ;;  %v966_v58 = vcombine.high %v957_v41, %v961_v54  ;;  %v265_v60 = vld [vmem:[#allocation2 + $0x50] sm:$0xff]  ;;  %v283_v6 = vcombine.high %v2946_v53, %v2952_v62  ;;  %v3050_v32 = vld [vmem:[#allocation2 + $0x2] sm:$0xff] }
  0x9a   : > { %v2950_v61 = vld [vmem:[#allocation2 + $0x30] sm:$0xff]  ;;  %v334_v1 = vcombine.low %v259_v50, %v263_v56  ;;  %v335_v2 = vcombine.high %v259_v50, %v263_v56  ;;  %v350_v3 = vcombine.low %v261_v51, %v265_v60  ;;  %v351_v4 = vcombine.high %v261_v51, %v265_v60 }
  0x9b   : > { %v267_v5 = vcombine.high %v2944_v52, %v2950_v61  ;;  %v2962_v7 = vrot.slane %v965_v57, %v2894_v26  ;;  %v2965_v8 = vrot.slane %v981_v59, %v2894_v26  ;;  %v2981_v13 = vrot.slane %v966_v58, %v2894_v26  ;;  %v3058_v34 = vld [vmem:[#allocation2 + $0x32] sm:$0xff]  ;;  %v3064_v36 = vld [vmem:[#allocation2 + $0x4a] sm:$0xff] }
  0x9c   : > { %v2968_v9 = vrot.slane %v334_v1, %v2894_v26  ;;  %v2971_v10 = vrot.slane %v350_v3, %v2894_v26  ;;  %v2988_v16 = vrot.slane %v982_v63, %v2894_v26  ;;  %v3005_v22 = vrot.slane %v351_v4, %v2894_v26 }
  0x9d   : > { %1191 = vrot.lane.b32.xlu1 %v963_v55, %s2771_s20  ;;  %1411 = vrot.lane.b32.xlu0 %v2877_v20, %s2772_s21  ;;  %v998_v11 = vcombine.high %v2962_v7, %v2965_v8  ;;  %v997_v12 = vcombine.low %v2962_v7, %v2965_v8  ;;  %4401 = vst [vmem:[#allocation4_spill] sm:$0xff] %v2981_v13 }
  0x9e   : > { %v367_v14 = vcombine.high %v2968_v9, %v2971_v10  ;;  %v366_v15 = vcombine.low %v2968_v9, %v2971_v10  ;;  %4402 = vst [vmem:[#allocation5_spill] sm:$0xff] %v2988_v16  ;;  %v1013_v18 = vcombine.low %v2981_v13, %v2988_v16  ;;  %v2996_v19 = vrot.slane %v267_v5, %v2894_v26 }
  0x9f   : > { %v2999_v20 = vrot.slane %v283_v6, %v2894_v26  ;;  %4406 = vst [vmem:[#allocation9_spill] sm:$0xff] %v3005_v22 }
  0xa0   : > { %4403 = vst [vmem:[#allocation6_spill] sm:$0xff] %v2996_v19 }
  0xa1   : > { %1415 = vrot.lane.b32.xlu1 %v960_v29, %s2772_s21  ;;  %1419 = vrot.lane.b32.xlu0 %v2879_v21, %s2772_s21  ;;  %4404 = vst [vmem:[#allocation7_spill] sm:$0xff] %v2999_v20  ;;  %v3002_v21 = vrot.slane %v335_v2, %v2894_v26 }
  0xa3   : > { %4405 = vst [vmem:[#allocation8_spill] sm:$0xff] %v3002_v21  ;;  %v382_v23 = vcombine.low %v3002_v21, %v3005_v22 }
  0xa5   : > { %1423 = vrot.lane.b32.xlu1 %v2896_v30, %s2772_s21  ;;  %489 = vrot.lane.b32.xlu0 %v259_v50, %s2771_s20 }
  0xa9   : > { %493 = vrot.lane.b32.xlu1 %v261_v51, %s2771_s20  ;;  %497 = vrot.lane.b32.xlu0 %v263_v56, %s2771_s20 }
  0xad   : > { %501 = vrot.lane.b32.xlu1 %v265_v60, %s2771_s20  ;;  %1409 = vrot.lane.b32.xlu0 %v957_v41, %s2772_s21  ;;  %v2773_v41 = vmov 1934713408  }
  0xb1   : > { %1413 = vrot.lane.b32.xlu1 %v959_v47, %s2772_s21  ;;  %1417 = vrot.lane.b32.xlu0 %v961_v54, %s2772_s21  ;;  %v301_v47 = vunpack.c.l.s4 %v2773_v41 }
  0xb5   : > { %1421 = vrot.lane.b32.xlu1 %v963_v55, %s2772_s21  ;;  %487 = vrot.lane.b32.xlu0 %v2944_v52, %s2771_s20 }
  0xb9   : > { %491 = vrot.lane.b32.xlu1 %v2946_v53, %s2771_s20  ;;  %495 = vrot.lane.b32.xlu0 %v2950_v61, %s2771_s20 }
  0xbd   : > { %499 = vrot.lane.b32.xlu1 %v2952_v62, %s2771_s20  ;;  %719 = vrot.lane.b32.xlu0 %v259_v50, %s2772_s21  ;;  %v302_v50 = vunpack.c.0.s8 %v301_v47 }
  0xc1   : > { %723 = vrot.lane.b32.xlu1 %v261_v51, %s2772_s21  ;;  %727 = vrot.lane.b32.xlu0 %v263_v56, %s2772_s21  ;;  %v3079_v51 = vsub.s32 %v302_v50, %v2875_v17  ;;  %v266_v17 = vcombine.low %v2944_v52, %v2950_v61 }
  0xc3   : > { %v1012_v37 = vrot.slane %v998_v11, %v3079_v51  ;;  %v3112_v38 = vrot.slane %v997_v12, %v3079_v51  ;;  %v1089_v56 = vrot.slane %v1081_v46, %v3079_v51  ;;  %v1021_v63 = vrot.slane %v1013_v18, %v3079_v51 }
  0xc4   : > { %v3171_v10 = vrot.slane %v382_v23, %v3079_v51  ;;  %v3191_v23 = vrot.slane %v1082_v48, %v3079_v51 }
  0xc5   : > { %731 = vrot.lane.b32.xlu1 %v265_v60, %s2772_s21  ;;  %717 = vrot.lane.b32.xlu0 %v2944_v52, %s2772_s21  ;;  %4408 = vst [vmem:[#allocation11_spill] sm:$0xff] %v3112_v38  ;;  %v381_v52 = vrot.slane %v367_v14, %v3079_v51  ;;  %v1030_v6 = vcombine.high %v1012_v37, %v4363_v0 }
  0xc6   : > { %4412 = vst [vmem:[#allocation15_spill] sm:$0xff] %v3171_v10  ;;  %4413 = vst [vmem:[#allocation16_spill] sm:$0xff] %v3191_v23  ;;  %v1099_v47 = vcombine.high %v1089_v56, %v4363_v0 }
  0xc7   : > { %v399_v11 = vcombine.high %v381_v52, %v4363_v0 }
  0xc9   : > { %721 = vrot.lane.b32.xlu1 %v2946_v53, %s2772_s21  ;;  %725 = vrot.lane.b32.xlu0 %v2950_v61, %s2772_s21 }
  0xcd   : > { %729 = vrot.lane.b32.xlu1 %v2952_v62, %s2772_s21  ;;  %2034 = vrot.lane.b32.xlu0 %v2889_v24, %s2771_s20 }
  0xd1   : > { %2038 = vrot.lane.b32.xlu1 %v2898_v31, %s2771_s20  ;;  %2042 = vrot.lane.b32.xlu0 %v2891_v25, %s2771_s20 }
  0xd5   : > { %2046 = vrot.lane.b32.xlu1 %v2909_v35, %s2771_s20  ;;  %2032 = vrot.lane.b32.xlu0 %v3050_v32, %s2771_s20 }
  0xd9   : > { %2036 = vrot.lane.b32.xlu1 %v3056_v33, %s2771_s20  ;;  %2040 = vrot.lane.b32.xlu0 %v3058_v34, %s2771_s20 }
  0xdd   : > { %2044 = vrot.lane.b32.xlu1 %v3064_v36, %s2771_s20  ;;  %2264 = vrot.lane.b32.xlu0 %v2889_v24, %s2772_s21  ;;  %v1080_v24 = vrot.slane %v1066_v44, %v3079_v51  ;;  %v274_v44 = vrot.slane %v266_v17, %v2894_v26 }
  0xdf   : > { %v1098_v59 = vcombine.high %v1080_v24, %v4363_v0 }
  0xe1   : > { %2268 = vrot.lane.b32.xlu1 %v2898_v31, %s2772_s21  ;;  %2272 = vrot.lane.b32.xlu0 %v2891_v25, %s2772_s21  ;;  %v3093_v25 = vrot.slane %v1065_v45, %v3079_v51  ;;  %v282_v31 = vcombine.low %v2946_v53, %v2952_v62  ;;  %v1029_v45 = vcombine.high %v3112_v38, %v4363_v0 }
  0xe2   : > { %v3127_v53 = vrot.slane %v366_v15, %v3079_v51  ;;  %v1918_v62 = vcombine.low %v2926_v42, %v2929_v43 }
  0xe3   : > { %4407 = vst [vmem:[#allocation10_spill] sm:$0xff] %v3093_v25  ;;  %v290_v54 = vrot.slane %v282_v31, %v2894_v26 }
  0xe4   : > { %4409 = vst [vmem:[#allocation12_spill] sm:$0xff] %v3127_v53  ;;  %v398_v55 = vcombine.high %v3127_v53, %v4363_v0  ;;  %v3156_v2 = vrot.slane %v1918_v62, %v3079_v51 }
  0xe5   : > { %2276 = vrot.lane.b32.xlu1 %v2909_v35, %s2772_s21  ;;  %2262 = vrot.lane.b32.xlu0 %v3050_v32, %s2772_s21  ;;  %v1097_v35 = vcombine.high %v3093_v25, %v4363_v0  ;;  %v299_v57 = vcombine.high %v274_v44, %v290_v54  ;;  %v298_v58 = vcombine.low %v274_v44, %v290_v54 }
  0xe6   : > { %4411 = vst [vmem:[#allocation14_spill] sm:$0xff] %v3156_v2  ;;  %v1950_v5 = vcombine.high %v3156_v2, %v4363_v0 }
  0xe7   : > { %v313_v60 = vrot.slane %v299_v57, %v3079_v51  ;;  %v3143_v61 = vrot.slane %v298_v58, %v3079_v51  ;;  %v1031_v57 = vcombine.high %v1021_v63, %v4363_v0 }
  0xe9   : > { %2266 = vrot.lane.b32.xlu1 %v3056_v33, %s2772_s21  ;;  %2270 = vrot.lane.b32.xlu0 %v3058_v34, %s2772_s21  ;;  %4410 = vst [vmem:[#allocation13_spill] sm:$0xff] %v3143_v61  ;;  %v330_v1 = vcombine.high %v3143_v61, %v4363_v0 }
  0xed   : > { %2274 = vrot.lane.b32.xlu1 %v3064_v36, %s2772_s21  ;;  %1134 = vrot.lane.b32.xlu0 %v1080_v24, %s2774_s22 }
  0xf1   : > { %1130 = vrot.lane.b32.xlu1 %v1097_v35, %s2775_s23  ;;  %1106 = vrot.lane.b32.xlu0 %v1012_v37, %s2774_s22  ;;  %v331_v35 = vcombine.high %v313_v60, %v4363_v0 }
  0xf5   : > { %1102 = vrot.lane.b32.xlu1 %v1029_v45, %s2775_s23  ;;  %435 = vrot.lane.b32.xlu0 %v381_v52, %s2774_s22 }
  0xf9   : > { %431 = vrot.lane.b32.xlu1 %v398_v55, %s2775_s23  ;;  %1142 = vrot.lane.b32.xlu0 %v1089_v56, %s2776_s24 }
  0xfd   : > { %1138 = vrot.lane.b32.xlu1 %v1098_v59, %s2777_s25  ;;  %407 = vrot.lane.b32.xlu0 %v313_v60, %s2774_s22 }
  0xff   : > { %v1182_v46 = vpop.permute.xlu0 %1181 }
 0x101   : > { %1114 = vrot.lane.b32.xlu0 %v1021_v63, %s2776_s24  ;;  %403 = vrot.lane.b32.xlu1 %v330_v1, %s2775_s23 }
 0x103   : > { %v1186_v3 = vpop.permute.xlu1 %1185  ;;  %v1190_v4 = vpop.permute.xlu0 %1189 }
 0x104   : > { %v1271_v7 = vcombine.low %v1182_v46, %v1190_v4  ;;  %v1272_v37 = vcombine.high %v1182_v46, %v1190_v4 }
 0x105   : > { %1983 = vrot.lane.b32.xlu0 %v1950_v5, %s2775_s23  ;;  %1110 = vrot.lane.b32.xlu1 %v1030_v6, %s2777_s25 }
 0x106   : > { %v3178_v14 = vrot.slane %v1271_v7, %v2894_v26  ;;  %v3231_v58 = vrot.slane %v1272_v37, %v2894_v26 }
 0x107   : > { %v1194_v8 = vpop.permute.xlu1 %1193  ;;  %v3165_v9 = vpop.permute.xlu0 %1179 }
 0x108   : > { %v1287_v12 = vcombine.low %v1186_v3, %v1194_v8  ;;  %v1288_v17 = vcombine.high %v1186_v3, %v1194_v8 }
 0x109   : > { %443 = vrot.lane.b32.xlu0 %v3171_v10, %s2776_s24  ;;  %439 = vrot.lane.b32.xlu1 %v399_v11, %s2777_s25 }
 0x10a   : > { %v3181_v15 = vrot.slane %v1287_v12, %v2894_v26  ;;  %v3217_v45 = vrot.slane %v1288_v17, %v2894_v26 }
 0x10b   : > { %v3183_v18 = vpop.permute.xlu1 %1183  ;;  %v3185_v41 = vpop.permute.xlu0 %1187 }
 0x10c   : > { %v1304_v24 = vcombine.high %v3178_v14, %v3181_v15  ;;  %v1203_v39 = vcombine.low %v3165_v9, %v3185_v41  ;;  %v1319_v63 = vcombine.low %v3231_v58, %v3217_v45 }
 0x10d   : > { %1150 = vrot.lane.b32.xlu0 %v3191_v23, %s2778_s26  ;;  %1146 = vrot.lane.b32.xlu1 %v1099_v47, %s2779_s27 }
 0x10e   : > { %v3204_v40 = vrot.slane %v1304_v24, %v3079_v51  ;;  %v3220_v52 = vrot.slane %v1203_v39, %v2894_v26  ;;  %v3260_v7 = vrot.slane %v1319_v63, %v3079_v51 }
 0x10f   : > { %v3206_v48 = vpop.permute.xlu1 %1191  ;;  %v3208_v31 = vpop.permute.xlu0 %1411 }
 0x110   : > { %v1219_v44 = vcombine.low %v3183_v18, %v3206_v48 }
 0x111   : > { %411 = vrot.lane.b32.xlu1 %v331_v35, %s2777_s25  ;;  %1372 = vrot.lane.b32.xlu0 %v3204_v40, %s2774_s22 }
 0x112   : > { %v3223_v54 = vrot.slane %v1219_v44, %v2894_v26 }
 0x113   : > { %v3225_v55 = vpop.permute.xlu1 %1415  ;;  %v3227_v56 = vpop.permute.xlu0 %1419 }
 0x114   : > { %v1236_v60 = vcombine.high %v3220_v52, %v3223_v54  ;;  %v1501_v62 = vcombine.low %v3208_v31, %v3227_v56  ;;  %v1502_v2 = vcombine.high %v3208_v31, %v3227_v56 }
 0x115   : > { %1118 = vrot.lane.b32.xlu1 %v1031_v57, %s2779_s27 }
 0x116   : > { %v3241_v46 = vrot.slane %v1236_v60, %v3079_v51  ;;  %v3254_v5 = vrot.slane %v1501_v62, %v2894_v26 }
 0x117   : > { %v3245_v1 = vpop.permute.xlu1 %1423  ;;  %v3247_v3 = vpop.permute.xlu0 %489 }
 0x118   : > { %v1517_v4 = vcombine.low %v3225_v55, %v3245_v1  ;;  %1344 = vrot.lane.b32.xlu0 %v3241_v46, %s2774_s22 }
 0x11a   : > { %v3257_v6 = vrot.slane %v1517_v4, %v2894_v26 }
 0x11b   : > { %v494_v8 = vpop.permute.xlu1 %493  ;;  %v3262_v11 = vpop.permute.xlu0 %497 }
 0x11c   : > { %1380 = vrot.lane.b32.xlu0 %v3260_v7, %s2776_s24  ;;  %v1534_v47 = vcombine.high %v3254_v5, %v3257_v6  ;;  %v579_v24 = vcombine.low %v3247_v3, %v3262_v11 }
 0x11e   : > { %v3273_v17 = vrot.slane %v1534_v47, %v3079_v51  ;;  %v3278_v44 = vrot.slane %v579_v24, %v2894_v26 }
 0x11f   : > { %v502_v39 = vpop.permute.xlu1 %501  ;;  %v1410_v35 = vpop.permute.xlu0 %1409 }
 0x120   : > { %v595_v37 = vcombine.low %v494_v8, %v502_v39  ;;  %1602 = vrot.lane.b32.xlu1 %v3273_v17, %s2774_s22 }
 0x122   : > { %v3281_v57 = vrot.slane %v595_v37, %v2894_v26 }
 0x123   : > { %v1414_v60 = vpop.permute.xlu1 %1413  ;;  %v1418_v62 = vpop.permute.xlu0 %1417 }
 0x124   : > { %v612_v4 = vcombine.high %v3278_v44, %v3281_v57  ;;  %v1434_v47 = vcombine.high %v1410_v35, %v1418_v62  ;;  %v1433_v29 = vcombine.low %v1410_v35, %v1418_v62 }
 0x126   : > { %v3288_v30 = vrot.slane %v612_v4, %v3079_v51  ;;  %v3293_v37 = vrot.slane %v1434_v47, %v2894_v26  ;;  %v3302_v4 = vrot.slane %v1433_v29, %v2894_v26  ;;  %v1220_v47 = vcombine.high %v3183_v18, %v3206_v48 }
 0x127   : > { %v1422_v28 = vpop.permute.xlu1 %1421  ;;  %v488_v27 = vpop.permute.xlu0 %487  ;;  %v1204_v29 = vcombine.high %v3165_v9, %v3185_v41 }
 0x128   : > { %v1449_v24 = vcombine.low %v1414_v60, %v1422_v28  ;;  %v1450_v49 = vcombine.high %v1414_v60, %v1422_v28  ;;  %680 = vrot.lane.b32.xlu1 %v3288_v30, %s2774_s22  ;;  %4414 = vst [vmem:[#allocation17_spill] sm:$0xff] %v3293_v37  ;;  %v3318_v28 = vrot.slane %v1220_v47, %v2894_v26 }
 0x12a   : > { %v3296_v63 = vrot.slane %v1449_v24, %v2894_v26  ;;  %v3299_v50 = vrot.slane %v1450_v49, %v2894_v26 }
 0x12b   : > { %v492_v35 = vpop.permute.xlu1 %491  ;;  %v496_v62 = vpop.permute.xlu0 %495 }
 0x12c   : > { %4415 = vst [vmem:[#allocation18_spill] sm:$0xff] %v3299_v50  ;;  %v1466_v60 = vcombine.high %v3302_v4, %v3296_v63  ;;  %v512_v12 = vcombine.high %v488_v27, %v496_v62  ;;  %v511_v24 = vcombine.low %v488_v27, %v496_v62  ;;  %v596_v62 = vcombine.high %v494_v8, %v502_v39 }
 0x12d   : > { %v1518_v39 = vcombine.high %v3225_v55, %v3245_v1 }
 0x12e   : > { %v3311_v49 = vrot.slane %v1466_v60, %v3079_v51  ;;  %v3321_v18 = vrot.slane %v512_v12, %v2894_v26  ;;  %v3330_v9 = vrot.slane %v511_v24, %v2894_v26  ;;  %v580_v12 = vcombine.high %v3247_v3, %v3262_v11 }
 0x12f   : > { %v500_v0 = vpop.permute.xlu1 %499  ;;  %v720_v59 = vpop.permute.xlu0 %719  ;;  %v3346_v47 = vrot.slane %v596_v62, %v2894_v26  ;;  %v3368_v62 = vrot.slane %v1518_v39, %v2894_v26 }
 0x130   : > { %v527_v61 = vcombine.low %v492_v35, %v500_v0  ;;  %v528_v53 = vcombine.high %v492_v35, %v500_v0  ;;  %1574 = vrot.lane.b32.xlu1 %v3311_v49, %s2774_s22  ;;  %4416 = vst [vmem:[#allocation19_spill] sm:$0xff] %v3321_v18  ;;  %v3333_v35 = vrot.slane %v1204_v29, %v2894_v26 }
 0x131   : > { %v3354_v25 = vrot.slane %v580_v12, %v2894_v26 }
 0x132   : > { %v3324_v27 = vrot.slane %v527_v61, %v2894_v26  ;;  %v3327_v48 = vrot.slane %v528_v53, %v2894_v26  ;;  %v1251_v8 = vcombine.low %v3333_v35, %v3318_v28 }
 0x133   : > { %v724_v0 = vpop.permute.xlu1 %723  ;;  %v728_v41 = vpop.permute.xlu0 %727  ;;  %v627_v12 = vcombine.low %v3354_v25, %v3346_v47 }
 0x134   : > { %4417 = vst [vmem:[#allocation20_spill] sm:$0xff] %v3327_v48  ;;  %v544_v61 = vcombine.high %v3330_v9, %v3324_v27  ;;  %v810_v53 = vcombine.high %v720_v59, %v728_v41  ;;  %v809_v24 = vcombine.low %v720_v59, %v728_v41  ;;  %v3374_v41 = vrot.slane %v1251_v8, %v3079_v51 }
 0x135   : > { %v3388_v22 = vrot.slane %v627_v12, %v3079_v51 }
 0x136   : > { %v3349_v60 = vrot.slane %v544_v61, %v3079_v51  ;;  %v3359_v55 = vrot.slane %v810_v53, %v2894_v26  ;;  %v3371_v31 = vrot.slane %v809_v24, %v2894_v26  ;;  %v1516_v53 = vrot.slane %v1502_v2, %v2894_v26 }
 0x137   : > { %v732_v29 = vpop.permute.xlu1 %731  ;;  %v718_v38 = vpop.permute.xlu0 %717 }
 0x138   : > { %v825_v3 = vcombine.low %v724_v0, %v732_v29  ;;  %v826_v11 = vcombine.high %v724_v0, %v732_v29  ;;  %652 = vrot.lane.b32.xlu0 %v3349_v60, %s2774_s22  ;;  %4418 = vst [vmem:[#allocation21_spill] sm:$0xff] %v3359_v55  ;;  %v1320_v29 = vcombine.high %v3231_v58, %v3217_v45 }
 0x139   : > { %v1549_v2 = vcombine.low %v1516_v53, %v3368_v62 }
 0x13a   : > { %v3362_v59 = vrot.slane %v825_v3, %v2894_v26  ;;  %v3365_v1 = vrot.slane %v826_v11, %v2894_v26 }
 0x13b   : > { %v722_v56 = vpop.permute.xlu1 %721  ;;  %v726_v0 = vpop.permute.xlu0 %725 }
 0x13c   : > { %4419 = vst [vmem:[#allocation22_spill] sm:$0xff] %v3365_v1  ;;  %1352 = vrot.lane.b32.xlu0 %v3374_v41, %s2776_s24  ;;  %v842_v39 = vcombine.high %v3371_v31, %v3362_v59  ;;  %v742_v24 = vcombine.high %v718_v38, %v726_v0  ;;  %v741_v8 = vcombine.low %v718_v38, %v726_v0 }
 0x13e   : > { %v3391_v61 = vrot.slane %v842_v39, %v3079_v51  ;;  %v3399_v38 = vrot.slane %v742_v24, %v2894_v26  ;;  %v3408_v0 = vrot.slane %v741_v8, %v2894_v26  ;;  %v3411_v39 = vrot.slane %v1320_v29, %v3079_v51 }
 0x13f   : > { %v730_v3 = vpop.permute.xlu1 %729  ;;  %v2035_v11 = vpop.permute.xlu0 %2034  ;;  %v1481_v24 = vcombine.low %v3293_v37, %v3299_v50 }
 0x140   : > { %v757_v21 = vcombine.low %v722_v56, %v730_v3  ;;  %v758_v16 = vcombine.high %v722_v56, %v730_v3  ;;  %688 = vrot.lane.b32.xlu0 %v3388_v22, %s2776_s24  ;;  %910 = vrot.lane.b32.xlu1 %v3391_v61, %s2774_s22  ;;  %4420 = vst [vmem:[#allocation23_spill] sm:$0xff] %v3399_v38 }
 0x141   : > { %v3414_v3 = vrot.slane %v1549_v2, %v3079_v51 }
 0x142   : > { %v3402_v45 = vrot.slane %v757_v21, %v2894_v26  ;;  %v3405_v58 = vrot.slane %v758_v16, %v2894_v26 }
 0x143   : > { %v2039_v12 = vpop.permute.xlu1 %2038  ;;  %v2043_v56 = vpop.permute.xlu0 %2042 }
 0x144   : > { %4421 = vst [vmem:[#allocation24_spill] sm:$0xff] %v3405_v58  ;;  %1388 = vrot.lane.b32.xlu0 %v3411_v39, %s2778_s26  ;;  %1610 = vrot.lane.b32.xlu1 %v3414_v3, %s2776_s24  ;;  %v774_v16 = vcombine.high %v3408_v0, %v3402_v45  ;;  %v2125_v21 = vcombine.high %v2035_v11, %v2043_v56 }
 0x145   : > { %v2124_v8 = vcombine.low %v2035_v11, %v2043_v56 }
 0x146   : > { %v3427_v2 = vrot.slane %v774_v16, %v3079_v51  ;;  %v3434_v19 = vrot.slane %v2125_v21, %v2894_v26  ;;  %v1550_v21 = vcombine.high %v1516_v53, %v3368_v62 }
 0x147   : > { %v2047_v13 = vpop.permute.xlu1 %2046  ;;  %v3424_v29 = vpop.permute.xlu0 %2032  ;;  %v3443_v56 = vrot.slane %v2124_v8, %v2894_v26 }
 0x148   : > { %4422 = vst [vmem:[#allocation25_spill] sm:$0xff] %v3424_v29  ;;  %v2140_v23 = vcombine.low %v2039_v12, %v2047_v13  ;;  %v2141_v20 = vcombine.high %v2039_v12, %v2047_v13  ;;  %882 = vrot.lane.b32.xlu1 %v3427_v2, %s2774_s22  ;;  %v3450_v13 = vrot.slane %v1481_v24, %v3079_v51 }
 0x149   : > { %v857_v12 = vcombine.low %v3359_v55, %v3365_v1  ;;  %v559_v55 = vcombine.low %v3321_v18, %v3327_v48  ;;  %v1252_v18 = vcombine.high %v3333_v35, %v3318_v28  ;;  %v789_v35 = vcombine.low %v3399_v38, %v3405_v58 }
 0x14a   : > { %v3437_v10 = vrot.slane %v2140_v23, %v2894_v26  ;;  %v3440_v11 = vrot.slane %v2141_v20, %v2894_v26  ;;  %v4429_v58 = vcombine.low %v3220_v52, %v3223_v54  ;;  %v4432_v52 = vcombine.low %v3254_v5, %v3257_v6 }
 0x14b   : > { %v3445_v16 = vpop.permute.xlu1 %2036  ;;  %v3447_v50 = vpop.permute.xlu0 %2040  ;;  %v3468_v1 = vrot.slane %v857_v12, %v3079_v51  ;;  %v3493_v48 = vrot.slane %v559_v55, %v3079_v51  ;;  %v3510_v55 = vrot.slane %v1252_v18, %v3079_v51  ;;  %v4433_v5 = vcombine.low %v3178_v14, %v3181_v15 }
 0x14c   : > { %4423 = vst [vmem:[#allocation26_spill] sm:$0xff] %v3447_v50  ;;  %1582 = vrot.lane.b32.xlu1 %v3450_v13, %s2776_s24  ;;  %v2157_v20 = vcombine.high %v3443_v56, %v3437_v10  ;;  %v2056_v8 = vcombine.low %v3424_v29, %v3447_v50  ;;  %v3536_v38 = vrot.slane %v4429_v58, %v3079_v51 }
 0x14d   : > { %v3553_v54 = vrot.slane %v4432_v52, %v3079_v51  ;;  %v628_v58 = vcombine.high %v3354_v25, %v3346_v47  ;;  %v3573_v25 = vrot.slane %v4433_v5, %v3079_v51  ;;  %v1465_v47 = vcombine.low %v3302_v4, %v3296_v63 }
 0x14e   : > { %v3471_v23 = vrot.slane %v2157_v20, %v3079_v51  ;;  %v3485_v53 = vrot.slane %v2056_v8, %v2894_v26  ;;  %v3490_v20 = vrot.slane %v1550_v21, %v3079_v51  ;;  %4430 = vst [vmem:[#allocation32_spill] sm:$0xff] %v3536_v38  ;;  %v4434_v14 = vcombine.low %v3278_v44, %v3281_v57 }
 0x14f   : > { %v3463_v37 = vpop.permute.xlu1 %2044  ;;  %v3465_v24 = vpop.permute.xlu0 %2264  ;;  %v543_v63 = vcombine.low %v3330_v9, %v3324_v27 }
 0x150   : > { %4424 = vst [vmem:[#allocation27_spill] sm:$0xff] %v3465_v24  ;;  %v2072_v43 = vcombine.low %v3445_v16, %v3463_v37  ;;  %918 = vrot.lane.b32.xlu1 %v3468_v1, %s2776_s24  ;;  %2225 = vrot.lane.b32.xlu0 %v3471_v23, %s2774_s22  ;;  %v3590_v15 = vrot.slane %v4434_v14, %v3079_v51 }
 0x151   : > { %v3618_v9 = vrot.slane %v543_v63, %v3079_v51 }
 0x152   : > { %v3482_v62 = vrot.slane %v2072_v43, %v2894_v26 }
 0x153   : > { %v3487_v12 = vpop.permute.xlu1 %2268  ;;  %v3497_v29 = vpop.permute.xlu0 %2272 }
 0x154   : > { %4425 = vst [vmem:[#allocation28_spill] sm:$0xff] %v3487_v12  ;;  %4426 = vst [vmem:[#allocation29_spill] sm:$0xff] %v3497_v29  ;;  %1618 = vrot.lane.b32.xlu1 %v3490_v20, %s2778_s26  ;;  %660 = vrot.lane.b32.xlu0 %v3493_v48, %s2776_s24  ;;  %v2089_v43 = vcombine.high %v3485_v53, %v3482_v62  ;;  %v2354_v21 = vcombine.low %v3465_v24, %v3497_v29 }
 0x155   : > { %v2088_v14 = vcombine.low %v3485_v53, %v3482_v62 }
 0x156   : > { %v3513_v28 = vrot.slane %v2089_v43, %v3079_v51  ;;  %v3527_v18 = vrot.slane %v2354_v21, %v2894_v26  ;;  %v3530_v43 = vrot.slane %v789_v35, %v3079_v51 }
 0x157   : > { %v3507_v8 = vpop.permute.xlu1 %2276  ;;  %v3538_v29 = vpop.permute.xlu0 %2262  ;;  %v3659_v53 = vrot.slane %v2088_v14, %v3079_v51 }
 0x158   : > { %4427 = vst [vmem:[#allocation30_spill] sm:$0xff] %v3507_v8  ;;  %v2370_v50 = vcombine.low %v3487_v12, %v3507_v8  ;;  %1360 = vrot.lane.b32.xlu0 %v3510_v55, %s2778_s26  ;;  %2197 = vrot.lane.b32.xlu1 %v3513_v28, %s2774_s22  ;;  %4428 = vst [vmem:[#allocation31_spill] sm:$0xff] %v3530_v43  ;;  %v4431_v12 = vmov 0.0  }
 0x159   : > { %v1267_v21 = vcombine.high %v3536_v38, %v4431_v12  ;;  %v1336_v6 = vcombine.high %v3204_v40, %v4431_v12  ;;  %v1335_v52 = vcombine.high %v3573_v25, %v4431_v12  ;;  %v1268_v40 = vcombine.high %v3241_v46, %v4431_v12 }
 0x15a   : > { %v3524_v24 = vrot.slane %v2370_v50, %v2894_v26  ;;  %v643_v4 = vcombine.high %v3590_v15, %v4431_v12  ;;  %v644_v57 = vcombine.high %v3288_v30, %v4431_v12  ;;  %v841_v46 = vcombine.low %v3371_v31, %v3362_v59 }
 0x15b   : > { %v3557_v8 = vpop.permute.xlu1 %2266  ;;  %v3562_v38 = vpop.permute.xlu0 %2270  ;;  %v575_v30 = vcombine.high %v3618_v9, %v4431_v12 }
 0x15c   : > { %890 = vrot.lane.b32.xlu1 %v3530_v43, %s2776_s24  ;;  %v2387_v50 = vcombine.high %v3527_v18, %v3524_v24  ;;  %v3567_v43 = vrot.slane %v628_v58, %v3079_v51  ;;  %v3629_v59 = vrot.slane %v841_v46, %v3079_v51 }
 0x15e   : > { %v3547_v35 = vrot.slane %v2387_v50, %v3079_v51  ;;  %v1565_v50 = vcombine.high %v3553_v54, %v4431_v12 }
 0x15f   : > { %v3592_v58 = vpop.permute.xlu0 %1134 }
 0x160   : > { %1340 = vrot.lane.b32.xlu1 %v1267_v21, %s2775_s23  ;;  %2455 = vrot.lane.b32.xlu0 %v3547_v35, %s2774_s22  ;;  %v3582_v21 = vpop.permute.xlu1 %2274  ;;  %4435 = vst [vmem:[#allocation33_spill] sm:$0xff] %v3592_v58  ;;  %v2755_v58 = vld [vmem:[#allocation2 + $0x3a] sm:$0xff] }
 0x163   : > { %v3613_v5 = vpop.permute.xlu0 %1106 }
 0x164   : > { %1598 = vrot.lane.b32.xlu1 %v1565_v50, %s2775_s23  ;;  %696 = vrot.lane.b32.xlu0 %v3567_v43, %s2778_s26  ;;  %v3603_v50 = vrot.slane %v1465_v47, %v3079_v51  ;;  %v3605_v44 = vpop.permute.xlu1 %1130  ;;  %4437 = vst [vmem:[#allocation35_spill] sm:$0xff] %v3613_v5 }
 0x165   : > { %4436 = vst [vmem:[#allocation34_spill] sm:$0xff] %v3605_v44 }
 0x166   : > { %v1497_v27 = vcombine.high %v3603_v50, %v4431_v12 }
 0x167   : > { %v3631_v31 = vpop.permute.xlu0 %435 }
 0x168   : > { %1376 = vrot.lane.b32.xlu1 %v1336_v6, %s2777_s25  ;;  %1368 = vrot.lane.b32.xlu0 %v1335_v52, %s2775_s23  ;;  %v1337_v6 = vcombine.high %v3260_v7, %v4431_v12  ;;  %v3624_v47 = vpop.permute.xlu1 %1102  ;;  %4439 = vst [vmem:[#allocation37_spill] sm:$0xff] %v3631_v31  ;;  %v773_v52 = vcombine.low %v3408_v0, %v3402_v45 }
 0x169   : > { %4438 = vst [vmem:[#allocation36_spill] sm:$0xff] %v3624_v47  ;;  %v576_v7 = vcombine.high %v3349_v60, %v4431_v12  ;;  %v1566_v45 = vcombine.high %v3273_v17, %v4431_v12  ;;  %v1269_v60 = vcombine.high %v3374_v41, %v4431_v12  ;;  %v2386_v0 = vcombine.low %v3527_v18, %v3524_v24 }
 0x16a   : > { %v2156_v17 = vcombine.low %v3443_v56, %v3437_v10  ;;  %v2302_v41 = vcombine.low %v3557_v8, %v3582_v21  ;;  %v2120_v24 = vcombine.high %v3659_v53, %v4431_v12  ;;  %v1498_v10 = vcombine.high %v3311_v49, %v4431_v12 }
 0x16b   : > { %v3656_v62 = vpop.permute.xlu0 %1142  ;;  %v3674_v18 = vrot.slane %v2386_v0, %v3079_v51  ;;  %v645_v49 = vcombine.high %v3388_v22, %v4431_v12  ;;  %v874_v0 = vcombine.high %v3391_v61, %v4431_v12 }
 0x16c   : > { %1348 = vrot.lane.b32.xlu1 %v1268_v40, %s2777_s25  ;;  %676 = vrot.lane.b32.xlu0 %v643_v4, %s2775_s23  ;;  %v873_v40 = vcombine.high %v3629_v59, %v4431_v12  ;;  %v3643_v63 = vpop.permute.xlu1 %431  ;;  %v3648_v4 = vrot.slane %v773_v52, %v3079_v51  ;;  %4441 = vst [vmem:[#allocation39_spill] sm:$0xff] %v3656_v62  ;;  %v4481_v62 = vld [vmem:[#allocation29_spill] sm:$0xff] }
 0x16d   : > { %4440 = vst [vmem:[#allocation38_spill] sm:$0xff] %v3643_v63  ;;  %v3685_v56 = vrot.slane %v2302_v41, %v2894_v26  ;;  %v3690_v52 = vrot.slane %v2156_v17, %v3079_v51 }
 0x170   : > { %684 = vrot.lane.b32.xlu1 %v644_v57, %s2777_s25  ;;  %1570 = vrot.lane.b32.xlu0 %v1497_v27, %s2775_s23  ;;  %v805_v57 = vcombine.high %v3648_v4, %v4431_v12  ;;  %v3669_v46 = vpop.permute.xlu1 %1138  ;;  %v2286_v27 = vcombine.low %v3538_v29, %v3562_v38 }
 0x171   : > { %4442 = vst [vmem:[#allocation40_spill] sm:$0xff] %v3669_v46 }
 0x174   : > { %1384 = vrot.lane.b32.xlu1 %v1337_v6, %s2779_s27  ;;  %648 = vrot.lane.b32.xlu0 %v575_v30, %s2775_s23  ;;  %v3678_v6 = vpop.permute.xlu0 %407  ;;  %v2418_v30 = vcombine.high %v3674_v18, %v4431_v12  ;;  %v3695_v14 = vpop.permute.xlu1 %403 }
 0x175   : > { %4443 = vst [vmem:[#allocation41_spill] sm:$0xff] %v3678_v6  ;;  %4444 = vst [vmem:[#allocation42_spill] sm:$0xff] %v3695_v14  ;;  %v4466_v6 = vld [vmem:[#allocation22_spill] sm:$0xff] }
 0x178   : > { %656 = vrot.lane.b32.xlu1 %v576_v7, %s2777_s25  ;;  %906 = vrot.lane.b32.xlu0 %v873_v40, %s2775_s23  ;;  %v3693_v7 = vrot.slane %v2286_v27, %v2894_v26  ;;  %v3713_v17 = vpop.permute.xlu1 %1110 }
 0x179   : > { %4446 = vst [vmem:[#allocation44_spill] sm:$0xff] %v3713_v17 }
 0x17a   : > { %v2318_v40 = vcombine.low %v3693_v7, %v3685_v56 }
 0x17c   : > { %1356 = vrot.lane.b32.xlu1 %v1269_v60, %s2779_s27  ;;  %1606 = vrot.lane.b32.xlu0 %v1566_v45, %s2777_s25  ;;  %v3703_v45 = vpop.permute.xlu0 %1114  ;;  %v2188_v60 = vcombine.high %v3690_v52, %v4431_v12  ;;  %v3716_v22 = vrot.slane %v2318_v40, %v3079_v51  ;;  %v3726_v27 = vpop.permute.xlu1 %439  ;;  %v1499_v40 = vcombine.high %v3450_v13, %v4431_v12 }
 0x17d   : > { %4445 = vst [vmem:[#allocation43_spill] sm:$0xff] %v3703_v45  ;;  %4449 = vst [vmem:[#allocation47_spill] sm:$0xff] %v3726_v27  ;;  %v2172_v13 = vcombine.low %v3434_v19, %v3440_v11  ;;  %v4469_v27 = vld [vmem:[#allocation25_spill] sm:$0xff] }
 0x17e   : > { %4447 = vst [vmem:[#allocation45_spill] sm:$0xff] %v3716_v22  ;;  %v2350_v61 = vcombine.high %v3716_v22, %v4431_v12 }
 0x180   : > { %2193 = vrot.lane.b32.xlu1 %v2120_v24, %s2775_s23  ;;  %878 = vrot.lane.b32.xlu0 %v805_v57, %s2775_s23  ;;  %v1338_v57 = vcombine.high %v3411_v39, %v4431_v12  ;;  %v3718_v41 = vpop.permute.xlu0 %1983  ;;  %v1567_v24 = vcombine.high %v3414_v3, %v4431_v12  ;;  %v806_v39 = vcombine.high %v3427_v2, %v4431_v12 }
 0x181   : > { %4448 = vst [vmem:[#allocation46_spill] sm:$0xff] %v3718_v41  ;;  %v1818_v3 = vcombine.low %v3050_v32, %v3058_v34  ;;  %v1270_v2 = vcombine.high %v3510_v55, %v4431_v12  ;;  %v1568_v34 = vcombine.high %v3490_v20, %v4431_v12  ;;  %v875_v55 = vcombine.high %v3468_v1, %v4431_v12  ;;  %v4457_v1 = vld [vmem:[#allocation17_spill] sm:$0xff] }
 0x184   : > { %1578 = vrot.lane.b32.xlu0 %v1498_v10, %s2777_s25  ;;  %2451 = vrot.lane.b32.xlu1 %v2418_v30, %s2775_s23  ;;  %v577_v10 = vcombine.high %v3493_v48, %v4431_v12  ;;  %v3734_v30 = vpop.permute.xlu0 %443 }
 0x185   : > { %4450 = vst [vmem:[#allocation48_spill] sm:$0xff] %v3734_v30  ;;  %v4468_v30 = vld [vmem:[#allocation26_spill] sm:$0xff] }
 0x188   : > { %2221 = vrot.lane.b32.xlu0 %v2188_v60, %s2775_s23  ;;  %692 = vrot.lane.b32.xlu1 %v645_v49, %s2779_s27  ;;  %v1834_v49 = vcombine.low %v3056_v33, %v3064_v36  ;;  %v3746_v60 = vpop.permute.xlu1 %1146  ;;  %v3748_v48 = vpop.permute.xlu0 %1150  ;;  %v2189_v33 = vcombine.high %v3471_v23, %v4431_v12  ;;  %v4454_v23 = vld [vmem:[#allocation3_spill] sm:$0xff] }
 0x189   : > { %4451 = vst [vmem:[#allocation49_spill] sm:$0xff] %v3746_v60  ;;  %4452 = vst [vmem:[#allocation50_spill] sm:$0xff] %v3748_v48 }
 0x18a   : > { %v1842_v32 = vrot.slane %v1834_v49, %v2894_v26 }
 0x18c   : > { %914 = vrot.lane.b32.xlu0 %v874_v0, %s2777_s25  ;;  %1392 = vrot.lane.b32.xlu1 %v1338_v57, %s2780_s28  ;;  %v1826_v0 = vrot.slane %v1818_v3, %v2894_v26  ;;  %v3758_v36 = vpop.permute.xlu1 %411  ;;  %v3766_v57 = vpop.permute.xlu0 %1372  ;;  %v4458_v3 = vld [vmem:[#allocation18_spill] sm:$0xff] }
 0x18d   : > { %4453 = vst [vmem:[#allocation51_spill] sm:$0xff] %v3758_v36  ;;  %v4459_v49 = vcombine.high %v4457_v1, %v4458_v3  ;;  %v4465_v36 = vld [vmem:[#allocation21_spill] sm:$0xff] }
 0x18e   : > { %v1850_v20 = vcombine.low %v1826_v0, %v1842_v32 }
 0x190   : > { %1614 = vrot.lane.b32.xlu0 %v1567_v24, %s2779_s27  ;;  %2423 = vrot.lane.b32.xlu1 %v2350_v61, %s2775_s23  ;;  %v4455_v24 = vcombine.high %v2926_v42, %v4454_v23  ;;  %v3789_v42 = vrot.slane %v1850_v20, %v3079_v51  ;;  %v2121_v20 = vcombine.high %v3513_v28, %v4431_v12 }
 0x191   : > { %v2073_v28 = vcombine.high %v3445_v16, %v3463_v37  ;;  %v4470_v37 = vld [vmem:[#allocation16_spill] sm:$0xff] }
 0x192   : > { %v3772_v61 = vrot.slane %v4455_v24, %v3079_v51  ;;  %4460 = vst [vmem:[#allocation17_spill] sm:$0xff] %v3789_v42  ;;  %v1100_v16 = vcombine.high %v4470_v37, %v4431_v12  ;;  %v4475_v37 = vld [vmem:[#allocation31_spill] sm:$0xff] }
 0x193   : > { %v3844_v31 = vrot.slane %v2073_v28, %v2894_v26  ;;  %v807_v45 = vcombine.high %v4475_v37, %v4431_v12  ;;  %v4480_v37 = vld [vmem:[#allocation28_spill] sm:$0xff] }
 0x194   : > { %886 = vrot.lane.b32.xlu0 %v806_v39, %s2777_s25  ;;  %664 = vrot.lane.b32.xlu1 %v577_v10, %s2779_s27  ;;  %v3777_v39 = vpop.permute.xlu1 %1118  ;;  %v3779_v10 = vpop.permute.xlu0 %1344 }
 0x195   : > { %4456 = vst [vmem:[#allocation3_spill] sm:$0xff] %v3777_v39  ;;  %v4473_v39 = vld [vmem:[#allocation20_spill] sm:$0xff] }
 0x198   : > { %1586 = vrot.lane.b32.xlu0 %v1499_v40, %s2779_s27  ;;  %1364 = vrot.lane.b32.xlu1 %v1270_v2, %s2780_s28  ;;  %v1496_v40 = vrot.slane %v4459_v49, %v3079_v51  ;;  %v3786_v2 = vrot.slane %v2172_v13, %v3079_v51  ;;  %v3800_v23 = vpop.permute.xlu0 %1380  ;;  %v4461_v13 = vld [vmem:[#allocation15_spill] sm:$0xff]  ;;  %v646_v49 = vcombine.high %v3567_v43, %v4431_v12 }
 0x199   : > { %v400_v24 = vcombine.high %v4461_v13, %v4431_v12  ;;  %v4462_v13 = vld [vmem:[#allocation6_spill] sm:$0xff] }
 0x19a   : > { %v1500_v48 = vcombine.high %v1496_v40, %v4431_v12 }
 0x19c   : > { %2229 = vrot.lane.b32.xlu0 %v2189_v33, %s2777_s25  ;;  %1622 = vrot.lane.b32.xlu1 %v1568_v34, %s2780_s28  ;;  %v2419_v33 = vcombine.high %v3547_v35, %v4431_v12  ;;  %v3796_v34 = vpop.permute.xlu1 %1602  ;;  %v2319_v35 = vcombine.high %v3693_v7, %v3685_v56 }
 0x1a0   : > { %922 = vrot.lane.b32.xlu0 %v875_v55, %s2779_s27  ;;  %1987 = vrot.lane.b32.xlu1 %v3772_v61, %s2774_s22  ;;  %v1882_v55 = vcombine.high %v3789_v42, %v4431_v12  ;;  %v3810_v1 = vpop.permute.xlu1 %680 }
 0x1a4   : > { %1590 = vrot.lane.b32.xlu0 %v1496_v40, %s2778_s26  ;;  %2233 = vrot.lane.b32.xlu1 %v3786_v2, %s2776_s24 }
 0x1a8   : > { %1955 = vrot.lane.b32.xlu0 %v1882_v55, %s2775_s23  ;;  %2459 = vrot.lane.b32.xlu1 %v2419_v33, %s2777_s25  ;;  %v3818_v33 = vpop.permute.xlu1 %1574  ;;  %v2333_v55 = vrot.slane %v2319_v35, %v3079_v51  ;;  %v4467_v35 = vcombine.high %v4465_v36, %v4466_v6 }
 0x1aa   : > { %v3812_v3 = vpop.permute.xlu0 %652  ;;  %v872_v14 = vrot.slane %v4467_v35, %v3079_v51  ;;  %v1851_v35 = vcombine.high %v1826_v0, %v1842_v32  ;;  %v2351_v60 = vcombine.high %v2333_v55, %v4431_v12 }
 0x1ac   : > { %2201 = vrot.lane.b32.xlu0 %v2121_v20, %s2777_s25  ;;  %447 = vrot.lane.b32.xlu1 %v400_v24, %s2779_s27  ;;  %v4463_v24 = vld [vmem:[#allocation7_spill] sm:$0xff] }
 0x1ad   : > { %v4464_v20 = vcombine.low %v4462_v13, %v4463_v24 }
 0x1ae   : > { %v3825_v56 = vpop.permute.xlu0 %1352 }
 0x1af   : > { %v322_v43 = vrot.slane %v4464_v20, %v3079_v51  ;;  %v4472_v20 = vld [vmem:[#allocation19_spill] sm:$0xff] }
 0x1b0   : > { %2427 = vrot.lane.b32.xlu0 %v2333_v55, %s2774_s22  ;;  %700 = vrot.lane.b32.xlu1 %v646_v49, %s2780_s28  ;;  %v2057_v49 = vcombine.high %v4469_v27, %v4468_v30  ;;  %v4474_v6 = vcombine.high %v4472_v20, %v4473_v39  ;;  %v1865_v39 = vrot.slane %v1851_v35, %v3079_v51  ;;  %v4479_v35 = vld [vmem:[#allocation30_spill] sm:$0xff] }
 0x1b2   : > { %v3827_v7 = vpop.permute.xlu1 %910  ;;  %v574_v36 = vrot.slane %v4474_v6, %v3079_v51  ;;  %v3853_v27 = vrot.slane %v2057_v49, %v2894_v26  ;;  %v3855_v30 = vpop.permute.xlu0 %688  ;;  %v4476_v49 = vld [vmem:[#allocation4_spill] sm:$0xff] }
 0x1b4   : > { %415 = vrot.lane.b32.xlu0 %v322_v43, %s2776_s24  ;;  %926 = vrot.lane.b32.xlu1 %v872_v14, %s2778_s26  ;;  %v2104_v28 = vcombine.low %v3853_v27, %v3844_v31 }
 0x1b6   : > { %v3846_v63 = vpop.permute.xlu1 %1610  ;;  %v3868_v0 = vpop.permute.xlu0 %1388  ;;  %v2112_v5 = vrot.slane %v2104_v28, %v3079_v51 }
 0x1b7   : > { %4471 = vst [vmem:[#allocation18_spill] sm:$0xff] %v3846_v63 }
 0x1b8   : > { %668 = vrot.lane.b32.xlu0 %v574_v36, %s2778_s26  ;;  %1154 = vrot.lane.b32.xlu1 %v1100_v16, %s2780_s28  ;;  %v4477_v16 = vld [vmem:[#allocation5_spill] sm:$0xff] }
 0x1b9   : > { %v4478_v20 = vcombine.high %v4476_v49, %v4477_v16  ;;  %v4482_v49 = vld [vmem:[#allocation27_spill] sm:$0xff] }
 0x1ba   : > { %v3863_v17 = vpop.permute.xlu1 %882  ;;  %v2355_v16 = vcombine.high %v4482_v49, %v4481_v62 }
 0x1bb   : > { %v1028_v6 = vrot.slane %v4478_v20, %v3079_v51 }
 0x1bc   : > { %894 = vrot.lane.b32.xlu0 %v807_v45, %s2779_s27  ;;  %1959 = vrot.lane.b32.xlu1 %v1865_v39, %s2774_s22  ;;  %v2371_v45 = vcombine.high %v4480_v37, %v4479_v35  ;;  %v1951_v35 = vcombine.high %v3772_v61, %v4431_v12  ;;  %v332_v37 = vcombine.high %v322_v43, %v4431_v12 }
 0x1bd   : > { %v3900_v40 = vrot.slane %v2355_v16, %v2894_v26  ;;  %v578_v61 = vcombine.high %v574_v36, %v4431_v12  ;;  %v2303_v43 = vcombine.high %v3557_v8, %v3582_v21  ;;  %v2752_v36 = vld [vmem:[#allocation2 + $0x22] sm:$0xff] }
 0x1be   : > { %v3870_v32 = vpop.permute.xlu1 %1582  ;;  %v3892_v28 = vrot.slane %v2371_v45, %v2894_v26 }
 0x1bf   : > { %v3931_v21 = vrot.slane %v2303_v43, %v2894_v26 }
 0x1c0   : > { %1122 = vrot.lane.b32.xlu0 %v1028_v6, %s2778_s26  ;;  %2205 = vrot.lane.b32.xlu1 %v2112_v5, %s2776_s24  ;;  %v2402_v62 = vcombine.low %v3900_v40, %v3892_v28 }
 0x1c2   : > { %v3881_v47 = vpop.permute.xlu1 %918  ;;  %v3883_v41 = vpop.permute.xlu0 %2225  ;;  %v3922_v16 = vrot.slane %v2402_v62, %v3079_v51  ;;  %v4484_v62 = vld [vmem:[#allocation8_spill] sm:$0xff] }
 0x1c4   : > { %1594 = vrot.lane.b32.xlu0 %v1500_v48, %s2780_s28  ;;  %2431 = vrot.lane.b32.xlu1 %v2351_v60, %s2777_s25  ;;  %v2190_v48 = vcombine.high %v3786_v2, %v4431_v12  ;;  %v2287_v2 = vcombine.high %v3538_v29, %v3562_v38  ;;  %v1883_v38 = vcombine.high %v1865_v39, %v4431_v12  ;;  %v2754_v29 = vld [vmem:[#allocation2 + $0xa] sm:$0xff] }
 0x1c6   : > { %v3894_v20 = vpop.permute.xlu1 %1618  ;;  %v3902_v55 = vpop.permute.xlu0 %660  ;;  %v3943_v44 = vrot.slane %v2287_v2, %v2894_v26  ;;  %v4487_v2 = vld [vmem:[#allocation23_spill] sm:$0xff] }
 0x1c7   : > { %4483 = vst [vmem:[#allocation15_spill] sm:$0xff] %v3894_v20 }
 0x1c8   : > { %1991 = vrot.lane.b32.xlu0 %v1951_v35, %s2777_s25  ;;  %419 = vrot.lane.b32.xlu1 %v332_v37, %s2779_s27  ;;  %v876_v35 = vcombine.high %v872_v14, %v4431_v12  ;;  %v2753_v37 = vld [vmem:[#allocation2 + $0x52] sm:$0xff] }
 0x1c9   : > { %v1903_v8 = vcombine.high %v2752_v36, %v2753_v37  ;;  %v4485_v14 = vld [vmem:[#allocation9_spill] sm:$0xff]  ;;  %v4488_v37 = vld [vmem:[#allocation24_spill] sm:$0xff] }
 0x1ca   : > { %v3908_v60 = vpop.permute.xlu1 %2197  ;;  %v3917_v45 = vpop.permute.xlu0 %1360  ;;  %v4486_v42 = vcombine.high %v4484_v62, %v4485_v14  ;;  %v4489_v62 = vcombine.high %v4487_v2, %v4488_v37  ;;  %v4490_v2 = vld [vmem:[#allocation32_spill] sm:$0xff] }
 0x1cb   : > { %v3949_v43 = vrot.slane %v1903_v8, %v2894_v26 }
 0x1cc   : > { %2237 = vrot.lane.b32.xlu0 %v2190_v48, %s2779_s27  ;;  %672 = vrot.lane.b32.xlu1 %v578_v61, %s2780_s28  ;;  %v3939_v46 = vrot.slane %v4486_v42, %v3079_v51  ;;  %v2334_v42 = vcombine.low %v3943_v44, %v3931_v21  ;;  %v804_v14 = vrot.slane %v4489_v62, %v3079_v51 }
 0x1ce   : > { %v3919_v49 = vpop.permute.xlu1 %890  ;;  %v3968_v22 = vrot.slane %v2334_v42, %v3079_v51 }
 0x1d0   : > { %2463 = vrot.lane.b32.xlu0 %v3922_v16, %s2776_s24  ;;  %930 = vrot.lane.b32.xlu1 %v876_v35, %s2780_s28  ;;  %v1887_v35 = vcombine.high %v2754_v29, %v2755_v58  ;;  %v2122_v58 = vcombine.high %v2112_v5, %v4431_v12  ;;  %v1032_v5 = vcombine.high %v1028_v6, %v4431_v12 }
 0x1d2   : > { %v1341_v48 = vpop.permute.xlu1 %1340  ;;  %v3933_v61 = vpop.permute.xlu0 %2455  ;;  %v3963_v29 = vrot.slane %v1887_v35, %v2894_v26 }
 0x1d3   : > { %v1395_v35 = vsel %vm458_vm4, %v4490_v2, %v1341_v48 }
 0x1d4   : > { %451 = vrot.lane.b32.xlu0 %v3939_v46, %s2778_s26  ;;  %1963 = vrot.lane.b32.xlu1 %v1883_v38, %s2777_s25  ;;  %v1934_v20 = vcombine.low %v3963_v29, %v3949_v43  ;;  %v1396_v62 = vsel %vm460_vm5, %v1395_v35, %v3779_v10  ;;  %v2756_v10 = vld [vmem:[#allocation2 + $0x2] sm:$0xff]  ;;  %v2758_v35 = vld [vmem:[#allocation2 + $0x1a] sm:$0xff] }
 0x1d6   : > { %v3953_v36 = vpop.permute.xlu1 %1598  ;;  %v3955_v39 = vpop.permute.xlu0 %696 }
 0x1d8   : > { %2209 = vrot.lane.b32.xlu1 %v2122_v58, %s2779_s27  ;;  %898 = vrot.lane.b32.xlu0 %v804_v14, %s2778_s26 }
 0x1da   : > { %v1377_v8 = vpop.permute.xlu1 %1376  ;;  %v1369_v38 = vpop.permute.xlu0 %1368 }
 0x1db   : > { %v1402_v58 = vsel %vm458_vm4, %v3573_v25, %v1369_v38  ;;  %v4491_v25 = vcombine.high %v4462_v13, %v4463_v24 }
 0x1dc   : > { %v1403_v37 = vsel %vm460_vm5, %v1402_v58, %v3766_v57  ;;  %2435 = vrot.lane.b32.xlu1 %v3968_v22, %s2776_s24  ;;  %1126 = vrot.lane.b32.xlu0 %v1032_v5, %s2780_s28  ;;  %v1942_v57 = vrot.slane %v1934_v20, %v3079_v51  ;;  %v2759_v58 = vld [vmem:[#allocation2 + $0x4a] sm:$0xff] }
 0x1dd   : > { %v1404_v6 = vsel %vm462_vm6, %v1403_v37, %v1377_v8  ;;  %v3989_v48 = vrot.slane %v4491_v25, %v3079_v51  ;;  %v2757_v8 = vld [vmem:[#allocation2 + $0x32] sm:$0xff]  ;;  %v1835_v13 = vcombine.high %v2758_v35, %v2759_v58 }
 0x1de   : > { %v1349_v42 = vpop.permute.xlu1 %1348  ;;  %v677_v63 = vpop.permute.xlu0 %676  ;;  %v1819_v2 = vcombine.high %v2756_v10, %v2757_v8  ;;  %v2420_v10 = vcombine.high %v3922_v16, %v4431_v12  ;;  %v2403_v16 = vcombine.high %v3900_v40, %v3892_v28 }
 0x1df   : > { %v1397_v38 = vsel %vm462_vm6, %v1396_v62, %v1349_v42  ;;  %v710_v5 = vsel %vm458_vm4, %v3590_v15, %v677_v63  ;;  %v808_v42 = vcombine.high %v804_v14, %v4431_v12  ;;  %v4492_v15 = vcombine.high %v3434_v19, %v3440_v11 }
 0x1e0   : > { %423 = vrot.lane.b32.xlu1 %v3989_v48, %s2778_s26  ;;  %1995 = vrot.lane.b32.xlu0 %v1942_v57, %s2776_s24  ;;  %v711_v20 = vsel %vm460_vm5, %v710_v5, %v3810_v1  ;;  %v4011_v25 = vrot.slane %v1819_v2, %v2894_v26  ;;  %v4014_v1 = vrot.slane %v1835_v13, %v2894_v26 }
 0x1e1   : > { %v2187_v63 = vrot.slane %v4492_v15, %v3079_v51  ;;  %v1405_v19 = vsel %vm464_vm7, %v1404_v6, %v3800_v23  ;;  %v1952_v5 = vcombine.high %v1942_v57, %v4431_v12  ;;  %v401_v23 = vcombine.high %v3939_v46, %v4431_v12 }
 0x1e2   : > { %v685_v24 = vpop.permute.xlu1 %684  ;;  %v1571_v37 = vpop.permute.xlu0 %1570  ;;  %v1866_v58 = vcombine.low %v4011_v25, %v4014_v1  ;;  %v1398_v28 = vsel %vm464_vm7, %v1397_v38, %v3825_v56 }
 0x1e3   : > { %v4006_v62 = vsel %vm462_vm6, %v711_v20, %v685_v24  ;;  %v2417_v24 = vrot.slane %v2403_v16, %v3079_v51  ;;  %v1625_v15 = vsel %vm458_vm4, %v3603_v50, %v1571_v37  ;;  %v1935_v50 = vcombine.high %v3963_v29, %v3949_v43 }
 0x1e4   : > { %902 = vrot.lane.b32.xlu1 %v808_v42, %s2780_s28  ;;  %2241 = vrot.lane.b32.xlu0 %v2187_v63, %s2778_s26  ;;  %v1874_v20 = vrot.slane %v1866_v58, %v3079_v51 }
 0x1e5   : > { %v1949_v43 = vrot.slane %v1935_v50, %v3079_v51 }
 0x1e6   : > { %v1385_v14 = vpop.permute.xlu1 %1384  ;;  %v649_v11 = vpop.permute.xlu0 %648  ;;  %v1884_v56 = vcombine.high %v1874_v20, %v4431_v12 }
 0x1e7   : > { %v1406_v8 = vsel %vm466_vm8, %v1405_v19, %v1385_v14  ;;  %v703_v2 = vsel %vm458_vm4, %v3618_v9, %v649_v11  ;;  %v2191_v9 = vcombine.high %v2187_v63, %v4431_v12 }
 0x1e8   : > { %1999 = vrot.lane.b32.xlu1 %v1952_v5, %s2779_s27  ;;  %2467 = vrot.lane.b32.xlu0 %v2420_v10, %s2779_s27  ;;  %v4028_v26 = vsel %vm468_vm9, %v1406_v8, %v3868_v0  ;;  %v704_v57 = vsel %vm460_vm5, %v703_v2, %v3812_v3  ;;  %v2105_v0 = vcombine.high %v3853_v27, %v3844_v31 }
 0x1e9   : > { %v2352_v5 = vcombine.high %v3968_v22, %v4431_v12  ;;  %v2421_v8 = vcombine.high %v2417_v24, %v4431_v12  ;;  %v333_v2 = vcombine.high %v3989_v48, %v4431_v12 }
 0x1ea   : > { %v657_v6 = vpop.permute.xlu1 %656  ;;  %v907_v35 = vpop.permute.xlu0 %906  ;;  %v2119_v38 = vrot.slane %v2105_v0, %v3079_v51 }
 0x1eb   : > { %v705_v13 = vsel %vm462_vm6, %v704_v57, %v657_v6 }
 0x1ec   : > { %2245 = vrot.lane.b32.xlu1 %v2191_v9, %s2780_s28  ;;  %455 = vrot.lane.b32.xlu0 %v401_v23, %s2780_s28  ;;  %v4044_v46 = vsel %vm464_vm7, %v705_v13, %v3902_v55 }
 0x1ee   : > { %v1357_v3 = vpop.permute.xlu1 %1356  ;;  %v4050_v40 = vpop.permute.xlu0 %1606 }
 0x1ef   : > { %v1399_v42 = vsel %vm466_vm8, %v1398_v28, %v1357_v3 }
 0x1f0   : > { %2471 = vrot.lane.b32.xlu1 %v2417_v24, %s2778_s26  ;;  %1967 = vrot.lane.b32.xlu0 %v1874_v20, %s2776_s24  ;;  %v4059_v55 = vsel %vm468_vm9, %v1399_v42, %v3917_v45  ;;  %v4494_v42 = vld [vmem:[#allocation15_spill] sm:$0xff] }
 0x1f2   : > { %v2194_v31 = vpop.permute.xlu1 %2193  ;;  %v879_v27 = vpop.permute.xlu0 %878 }
 0x1f3   : > { %v2248_v63 = vsel %vm458_vm4, %v3659_v53, %v2194_v31  ;;  %v933_v14 = vsel %vm458_vm4, %v3648_v4, %v879_v27  ;;  %v1626_v53 = vsel %vm460_vm5, %v1625_v15, %v3818_v33  ;;  %v2123_v4 = vcombine.high %v2119_v38, %v4431_v12 }
 0x1f4   : > { %1971 = vrot.lane.b32.xlu1 %v1884_v56, %s2779_s27  ;;  %2213 = vrot.lane.b32.xlu0 %v2119_v38, %s2778_s26  ;;  %v934_v45 = vsel %vm460_vm5, %v933_v14, %v3863_v17  ;;  %v4075_v19 = vsel %vm460_vm5, %v2248_v63, %v3908_v60 }
 0x1f6   : > { %v2452_v37 = vpop.permute.xlu1 %2451  ;;  %v1579_v11 = vpop.permute.xlu0 %1578 }
 0x1f7   : > { %v2485_v17 = vsel %vm458_vm4, %v3674_v18, %v2452_v37  ;;  %v1627_v10 = vsel %vm462_vm6, %v1626_v53, %v1579_v11  ;;  %v713_v18 = vsel %vm464_vm7, %v4006_v62, %v3855_v30  ;;  %v2335_v62 = vcombine.high %v3943_v44, %v3931_v21 }
 0x1f8   : > { %2217 = vrot.lane.b32.xlu1 %v2123_v4, %s2780_s28  ;;  %2439 = vrot.lane.b32.xlu0 %v2352_v5, %s2779_s27  ;;  %v4091_v60 = vsel %vm464_vm7, %v1627_v10, %v3870_v32  ;;  %v4095_v33 = vsel %vm460_vm5, %v2485_v17, %v3933_v61  ;;  %v1867_v32 = vcombine.high %v4011_v25, %v4014_v1  ;;  %v4495_v5 = vld [vmem:[#allocation45_spill] sm:$0xff] }
 0x1f9   : > { %v940_v61 = vsel %vm458_vm4, %v3629_v59, %v907_v35  ;;  %v1953_v1 = vcombine.high %v1949_v43, %v4431_v12  ;;  %v1632_v35 = vsel %vm458_vm4, %v3553_v54, %v3953_v36  ;;  %v4493_v36 = vld [vmem:[#allocation18_spill] sm:$0xff] }
 0x1fa   : > { %v693_v22 = vpop.permute.xlu1 %692  ;;  %v2222_v29 = vpop.permute.xlu0 %2221  ;;  %v941_v25 = vsel %vm460_vm5, %v940_v61, %v3827_v7  ;;  %v1881_v6 = vrot.slane %v1867_v32, %v3079_v51  ;;  %v2349_v7 = vrot.slane %v2335_v62, %v3079_v51  ;;  %v1633_v9 = vsel %vm460_vm5, %v1632_v35, %v3796_v34 }
 0x1fb   : > { %v714_v23 = vsel %vm466_vm8, %v713_v18, %v693_v22  ;;  %v2255_v16 = vsel %vm458_vm4, %v3690_v52, %v2222_v29  ;;  %v1634_v13 = vsel %vm462_vm6, %v1633_v9, %v4050_v40 }
 0x1fc   : > { %2475 = vrot.lane.b32.xlu1 %v2421_v8, %s2780_s28  ;;  %427 = vrot.lane.b32.xlu0 %v333_v2, %s2780_s28  ;;  %v2256_v30 = vsel %vm460_vm5, %v2255_v16, %v3883_v41  ;;  %v4117_v48 = vsel %vm468_vm9, %v714_v23, %v3955_v39  ;;  %v1885_v39 = vcombine.high %v1881_v6, %v4431_v12  ;;  %v4496_v8 = vld [vmem:[#allocation34_spill] sm:$0xff] }
 0x1fd   : > { %v1635_v34 = vsel %vm464_vm7, %v1634_v13, %v4493_v36  ;;  %v2353_v24 = vcombine.high %v2349_v7, %v4431_v12  ;;  %v4503_v13 = vld [vmem:[#allocation50_spill] sm:$0xff] }
 0x1fe   : > { %v4121_v59 = vpop.permute.xlu1 %1392  ;;  %v915_v52 = vpop.permute.xlu0 %914 }
 0x1ff   : > { %v942_v57 = vsel %vm462_vm6, %v941_v25, %v915_v52  ;;  %v4500_v25 = vld [vmem:[#allocation17_spill] sm:$0xff] }
 0x200   : > { %2007 = vrot.lane.b32.xlu1 %v1953_v1, %s2780_s28  ;;  %2003 = vrot.lane.b32.xlu0 %v1949_v43, %s2778_s26  ;;  %v4132_v41 = vsel %vm464_vm7, %v942_v57, %v3881_v47 }
 0x202   : > { %v2424_v44 = vpop.permute.xlu1 %2423  ;;  %v1615_v21 = vpop.permute.xlu0 %1614 }
 0x203   : > { %v1636_v40 = vsel %vm466_vm8, %v1635_v34, %v1615_v21  ;;  %v2478_v17 = vsel %vm458_vm4, %v4495_v5, %v2424_v44  ;;  %v4501_v44 = vld [vmem:[#allocation39_spill] sm:$0xff] }
 0x204   : > { %1979 = vrot.lane.b32.xlu1 %v1885_v39, %s2780_s28  ;;  %2443 = vrot.lane.b32.xlu0 %v2349_v7, %s2778_s26  ;;  %v1637_v31 = vsel %vm468_vm9, %v1636_v40, %v4494_v42  ;;  %v4502_v39 = vld [vmem:[#allocation49_spill] sm:$0xff]  ;;  %v4505_v42 = vld [vmem:[#allocation14_spill] sm:$0xff] }
 0x206   : > { %v665_v58 = vpop.permute.xlu1 %664  ;;  %v887_v47 = vpop.permute.xlu0 %886 }
 0x207   : > { %v707_v0 = vsel %vm466_vm8, %v4044_v46, %v665_v58  ;;  %v935_v51 = vsel %vm462_vm6, %v934_v45, %v887_v47  ;;  %v1408_v58 = vsel %vm470_vm10, %v4028_v26, %v4121_v59 }
 0x208   : > { %1975 = vrot.lane.b32.xlu0 %v1881_v6, %s2778_s26  ;;  %v4151_v54 = vsel %vm464_vm7, %v935_v51, %v3919_v49  ;;  %v1642_v34 = vrot.slane %v1408_v58, 4 }
 0x20a   : > { %v1365_v3 = vpop.permute.xlu1 %1364  ;;  %v1587_v28 = vpop.permute.xlu0 %1586 }
 0x20b   : > { %v4159_v46 = vsel %vm470_vm10, %v4059_v55, %v1365_v3  ;;  %v1629_v51 = vsel %vm466_vm8, %v4091_v60, %v1587_v28 }
 0x20c   : > { %2447 = vrot.lane.b32.xlu0 %v2353_v24, %s2780_s28 }
 0x20e   : > { %v1623_v20 = vpop.permute.xlu1 %1622  ;;  %v2230_v49 = vpop.permute.xlu0 %2229 }
 0x20f   : > { %v2257_v27 = vsel %vm462_vm6, %v2256_v30, %v2230_v49  ;;  %v1638_v56 = vsel %vm470_vm10, %v1637_v31, %v1623_v20  ;;  %v4499_v30 = vld [vmem:[#allocation40_spill] sm:$0xff]  ;;  %v4504_v49 = vld [vmem:[#allocation46_spill] sm:$0xff] }
 0x210   : > { %2697 = vmatprep.subr.msk.mxu0 %vm953_vm11, %v1638_v56  ;;  %v2017_v60 = vsel %vm458_vm4, %v4505_v42, %v4504_v49 }
 0x212   : > { %v1988_v38 = vpop.permute.xlu1 %1987  ;;  %v923_v15 = vpop.permute.xlu0 %922 }
 0x213   : > { %v2018_v28 = vsel %vm460_vm5, %v2017_v60, %v1988_v38  ;;  %v4506_v38 = vld [vmem:[#allocation36_spill] sm:$0xff] }
 0x216   : > { %v2234_v63 = vpop.permute.xlu1 %2233  ;;  %v1591_v14 = vpop.permute.xlu0 %1590 }
 0x217   : > { %v4168_v55 = vsel %vm464_vm7, %v2257_v27, %v2234_v63  ;;  %v1630_v3 = vsel %vm468_vm9, %v1629_v51, %v1591_v14 }
 0x21a   : > { %v2460_v45 = vpop.permute.xlu1 %2459  ;;  %v1956_v50 = vpop.permute.xlu0 %1955 }
 0x21b   : > { %v4172_v37 = vsel %vm462_vm6, %v4095_v33, %v2460_v45  ;;  %v4497_v33 = vld [vmem:[#allocation10_spill] sm:$0xff]  ;;  %v2010_v52 = vsel %vm458_vm4, %v4500_v25, %v1956_v50  ;;  %v944_v45 = vsel %vm466_vm8, %v4132_v41, %v923_v15 }
 0x21c   : > { %v1164_v2 = vsel %vm458_vm4, %v4497_v33, %v4496_v8  ;;  %v4508_v33 = vld [vmem:[#allocation35_spill] sm:$0xff] }
 0x21e   : > { %v4174_v53 = vpop.permute.xlu1 %447  ;;  %v2202_v11 = vpop.permute.xlu0 %2201 }
 0x21f   : > { %v2250_v4 = vsel %vm462_vm6, %v4075_v19, %v2202_v11  ;;  %v4498_v19 = vld [vmem:[#allocation33_spill] sm:$0xff] }
 0x220   : > { %v1165_v16 = vsel %vm460_vm5, %v1164_v2, %v4498_v19 }
 0x221   : > { %v1166_v62 = vsel %vm462_vm6, %v1165_v16, %v4499_v30  ;;  %v4511_v16 = vld [vmem:[#allocation3_spill] sm:$0xff] }
 0x222   : > { %v4180_v10 = vpop.permute.xlu1 %700  ;;  %v2428_v43 = vpop.permute.xlu0 %2427  ;;  %v1167_v21 = vsel %vm464_vm7, %v1166_v62, %v4501_v44  ;;  %v1641_v62 = vrot.slane %v4159_v46, 4  ;;  %v4512_v46 = vld [vmem:[#allocation38_spill] sm:$0xff] }
 0x223   : > { %v2479_v22 = vsel %vm460_vm5, %v2478_v17, %v2428_v43  ;;  %v1168_v7 = vsel %vm466_vm8, %v1167_v21, %v4502_v39  ;;  %v4507_v17 = vld [vmem:[#allocation11_spill] sm:$0xff]  ;;  %v2696_v21 = vld [vmem:[%s4360_s1 + $0x8] sm:$0xff] }
 0x224   : > { %v1157_v43 = vsel %vm458_vm4, %v4507_v17, %v4506_v38 }
 0x225   : > { %v1158_v2 = vsel %vm460_vm5, %v1157_v43, %v4508_v33  ;;  %v4518_v43 = vld [vmem:[#allocation13_spill] sm:$0xff] }
 0x226   : > { %v927_v18 = vpop.permute.xlu1 %926  ;;  %v4183_v29 = vpop.permute.xlu0 %415 }
 0x227   : > { %v945_v50 = vsel %vm468_vm9, %v944_v45, %v927_v18 }
 0x22a   : > { %v1155_v32 = vpop.permute.xlu1 %1154  ;;  %v669_v61 = vpop.permute.xlu0 %668 }
 0x22b   : > { %v4189_v23 = vsel %vm468_vm9, %v707_v0, %v669_v61  ;;  %v1169_v0 = vsel %vm468_vm9, %v1168_v7, %v4503_v13  ;;  %v4510_v61 = vld [vmem:[#allocation43_spill] sm:$0xff] }
 0x22c   : > { %v1170_v36 = vsel %vm470_vm10, %v1169_v0, %v1155_v32  ;;  %v4509_v32 = vld [vmem:[#allocation44_spill] sm:$0xff] }
 0x22d   : > { %v1646_v59 = vsel %vm953_vm11, %v1170_v36, %v1642_v34  ;;  %v1159_v41 = vsel %vm462_vm6, %v1158_v2, %v4509_v32  ;;  %v4519_v2 = vld [vmem:[#allocation41_spill] sm:$0xff] }
 0x22e   : > { %v1960_v1 = vpop.permute.xlu1 %1959  ;;  %v895_v6 = vpop.permute.xlu0 %894  ;;  %v1160_v19 = vsel %vm464_vm7, %v1159_v41, %v4510_v61  ;;  %v4520_v41 = vld [vmem:[#allocation51_spill] sm:$0xff] }
 0x22f   : > { %v4198_v57 = vsel %vm460_vm5, %v2010_v52, %v1960_v1  ;;  %v1161_v30 = vsel %vm466_vm8, %v1160_v19, %v4511_v16  ;;  %v937_v13 = vsel %vm466_vm8, %v4151_v54, %v895_v6  ;;  %v716_v54 = vsel %vm470_vm10, %v4117_v48, %v4180_v10  ;;  %v4516_v6 = vld [vmem:[#allocation48_spill] sm:$0xff]  ;;  %v4517_v10 = vld [vmem:[#allocation42_spill] sm:$0xff] }
 0x230   : > { %v950_v60 = vrot.slane %v716_v54, 4  ;;  %v459_v33 = vsel %vm458_vm4, %v4518_v43, %v4517_v10 }
 0x232   : > { %v2206_v35 = vpop.permute.xlu1 %2205  ;;  %v1123_v9 = vpop.permute.xlu0 %1122 }
 0x233   : > { %v4208_v47 = vsel %vm464_vm7, %v2250_v4, %v2206_v35  ;;  %v1162_v25 = vsel %vm468_vm9, %v1161_v30, %v1123_v9  ;;  %v4513_v9 = vld [vmem:[#allocation12_spill] sm:$0xff] }
 0x234   : > { %v472_v58 = vsel %vm458_vm4, %v4513_v9, %v4512_v46 }
 0x236   : > { %v2432_v24 = vpop.permute.xlu1 %2431  ;;  %v1595_v40 = vpop.permute.xlu0 %1594 }
 0x237   : > { %v4217_v20 = vsel %vm462_vm6, %v2479_v22, %v2432_v24  ;;  %v1631_v26 = vsel %vm470_vm10, %v1630_v3, %v1595_v40  ;;  %v4514_v3 = vld [vmem:[#allocation37_spill] sm:$0xff]  ;;  %v4515_v40 = vld [vmem:[#allocation47_spill] sm:$0xff] }
 0x238   : > { %2698 = vmatpush1.msk.msra.mxu0 %vm953_vm11, %v1631_v26  ;;  %v473_v24 = vsel %vm460_vm5, %v472_v58, %v4514_v3 }
 0x239   : > { %1689 = vmatprep.subr.mxu0 %v1646_v59 }
 0x23a   : > { %v4226_v31 = vpop.permute.xlu1 %419  ;;  %v1992_v27 = vpop.permute.xlu0 %1991 }
 0x23b   : > { %v4229_v56 = vsel %vm462_vm6, %v2018_v28, %v1992_v27 }
 0x23e   : > { %v673_v63 = vpop.permute.xlu1 %672  ;;  %v4231_v14 = vpop.permute.xlu0 %2237 }
 0x23f   : > { %v709_v61 = vsel %vm470_vm10, %v4189_v23, %v673_v63 }
 0x242   : > { %v931_v11 = vpop.permute.xlu1 %930  ;;  %v2464_v4 = vpop.permute.xlu0 %2463 }
 0x243   : > { %v946_v5 = vsel %vm470_vm10, %v945_v50, %v931_v11  ;;  %v2488_v16 = vsel %vm464_vm7, %v4172_v37, %v2464_v4 }
 0x244   : > { %2700 = vmatprep.subr.msk.mxu1 %vm953_vm11, %v946_v5 }
 0x246   : > { %v4241_v22 = vpop.permute.xlu1 %1963  ;;  %v452_v8 = vpop.permute.xlu0 %451 }
 0x24a   : > { %v4247_v15 = vpop.permute.xlu1 %2209  ;;  %v899_v18 = vpop.permute.xlu0 %898 }
 0x24b   : > { %v938_v0 = vsel %vm468_vm9, %v937_v13, %v899_v18 }
 0x24e   : > { %v4255_v52 = vpop.permute.xlu1 %2435  ;;  %v1127_v1 = vpop.permute.xlu0 %1126 }
 0x24f   : > { %v1163_v44 = vsel %vm470_vm10, %v1162_v25, %v1127_v1  ;;  %v949_v25 = vrot.slane %v709_v61, 4  ;;  %v2259_v1 = vsel %vm466_vm8, %v4168_v55, %v4231_v14 }
 0x250   : > { %v1645_v39 = vsel %vm953_vm11, %v1163_v44, %v1641_v62 }
 0x251   : > { %1690 = vmatpush1.msra.mxu0 %v1645_v39 }
 0x252   : > { %v424_v7 = vpop.permute.xlu1 %423  ;;  %v1996_v35 = vpop.permute.xlu0 %1995  ;;  %2699 = vmatmul.mubr.msk.f32.vlgmr.msra.gmra.mxu0 %vm1649_vm12, %v2696_v21 }
 0x253   : > { %2575 = vmatprep.mubr.f32.mxu0 %v4431_v12  ;;  %v474_v12 = vsel %vm462_vm6, %v473_v24, %v4515_v40  ;;  %v2020_v14 = vsel %vm464_vm7, %v4229_v56, %v1996_v35  ;;  %v2012_v35 = vsel %vm462_vm6, %v4198_v57, %v4241_v22 }
 0x254   : > { %v475_v49 = vsel %vm464_vm7, %v474_v12, %v4516_v6 }
 0x255   : > { %v476_v42 = vsel %vm466_vm8, %v475_v49, %v4174_v53  ;;  %v461_v53 = vsel %vm460_vm5, %v459_v33, %v4519_v2 }
 0x256   : > { %v903_v51 = vpop.permute.xlu1 %902  ;;  %v2242_v36 = vpop.permute.xlu0 %2241  ;;  %v477_v28 = vsel %vm468_vm9, %v476_v42, %v452_v8  ;;  %v463_v18 = vsel %vm462_vm6, %v461_v53, %v4520_v41 }
 0x257   : > { %v939_v34 = vsel %vm470_vm10, %v938_v0, %v903_v51  ;;  %v465_v19 = vsel %vm464_vm7, %v463_v18, %v4183_v29  ;;  %v2260_v29 = vsel %vm468_vm9, %v2259_v1, %v2242_v36  ;;  %v2252_v36 = vsel %vm466_vm8, %v4208_v47, %v4247_v15 }
 0x258   : > { %2701 = vmatpush1.msk.msra.mxu1 %vm953_vm11, %v939_v34  ;;  %v467_v30 = vsel %vm466_vm8, %v465_v19, %v4226_v31  ;;  %v956_v31 = vld [vmem:[%s4360_s1] sm:$0xff]  ;;  %v2481_v47 = vsel %vm464_vm7, %v4217_v20, %v4255_v52 }
 0x259   : > { %v469_v44 = vsel %vm468_vm9, %v467_v30, %v424_v7 }
 0x25a   : > { %v2000_v26 = vpop.permute.xlu1 %1999  ;;  %v2468_v59 = vpop.permute.xlu0 %2467 }
 0x25b   : > { %v2489_v62 = vsel %vm466_vm8, %v2488_v16, %v2468_v59  ;;  %v2021_v7 = vsel %vm466_vm8, %v2020_v14, %v2000_v26 }
 0x25e   : > { %v2246_v27 = vpop.permute.xlu1 %2245  ;;  %v456_v45 = vpop.permute.xlu0 %455 }
 0x25f   : > { %v478_v50 = vsel %vm470_vm10, %v477_v28, %v456_v45  ;;  %v2261_v39 = vsel %vm470_vm10, %v2260_v29, %v2246_v27 }
 0x260   : > { %v955_v11 = vsel %vm953_vm11, %v478_v50, %v950_v60  ;;  %v2495_v58 = vrot.slane %v2261_v39, 4  ;;  %v2703_v60 = vld [vmem:[%s4360_s1 + $0x10] sm:$0xff] }
 0x261   : > { %1769 = vmatprep.subr.mxu1 %v955_v11 }
 0x262   : > { %v2472_v5 = vpop.permute.xlu1 %2471  ;;  %v1968_v38 = vpop.permute.xlu0 %1967 }
 0x263   : > { %v2490_v23 = vsel %vm468_vm9, %v2489_v62, %v2472_v5  ;;  %v2013_v24 = vsel %vm464_vm7, %v2012_v35, %v1968_v38 }
 0x266   : > { %v1972_v17 = vpop.permute.xlu1 %1971  ;;  %v2214_v48 = vpop.permute.xlu0 %2213 }
 0x267   : > { %v2253_v56 = vsel %vm468_vm9, %v2252_v36, %v2214_v48  ;;  %v2014_v40 = vsel %vm466_vm8, %v2013_v24, %v1972_v17 }
 0x26a   : > { %v2218_v32 = vpop.permute.xlu1 %2217  ;;  %v2440_v8 = vpop.permute.xlu0 %2439 }
 0x26b   : > { %v2254_v3 = vsel %vm470_vm10, %v2253_v56, %v2218_v32  ;;  %v2482_v57 = vsel %vm466_vm8, %v2481_v47, %v2440_v8 }
 0x26c   : > { %v2494_v26 = vrot.slane %v2254_v3, 4 }
 0x26e   : > { %v2476_v63 = vpop.permute.xlu1 %2475  ;;  %v428_v21 = vpop.permute.xlu0 %427 }
 0x26f   : > { %v2491_v37 = vsel %vm470_vm10, %v2490_v23, %v2476_v63  ;;  %v471_v4 = vsel %vm470_vm10, %v469_v44, %v428_v21 }
 0x270   : > { %2704 = vmatprep.subr.msk.mxu0 %vm953_vm11, %v2491_v37  ;;  %v954_v55 = vsel %vm953_vm11, %v471_v4, %v949_v25 }
 0x271   : > { %1770 = vmatpush1.msra.mxu1 %v954_v55 }
 0x272   : > { %v2008_v46 = vpop.permute.xlu1 %2007  ;;  %v2004_v9 = vpop.permute.xlu0 %2003  ;;  %2702 = vmatmul.mubr.msk.f32.vlgmr.msra.gmra.mxu1 %vm1649_vm12, %v956_v31 }
 0x273   : > { %v2022_v13 = vsel %vm468_vm9, %v2021_v7, %v2004_v9 }
 0x274   : > { %v2023_v0 = vsel %vm470_vm10, %v2022_v13, %v2008_v46 }
 0x275   : > { %v2499_v51 = vsel %vm953_vm11, %v2023_v0, %v2495_v58 }
 0x276   : > { %v2444_v34 = vpop.permute.xlu0 %2443  ;;  %v1980_v59 = vpop.permute.xlu1 %1979 }
 0x277   : > { %v2483_v6 = vsel %vm468_vm9, %v2482_v57, %v2444_v34 }
 0x27a   : > { %v1976_v12 = vpop.permute.xlu0 %1975 }
 0x27b   : > { %v2015_v54 = vsel %vm468_vm9, %v2014_v40, %v1976_v12 }
 0x27c   : > { %v2016_v15 = vsel %vm470_vm10, %v2015_v54, %v1980_v59 }
 0x27d   : > { %v2498_v22 = vsel %vm953_vm11, %v2016_v15, %v2494_v26 }
 0x27e   : > { %v2448_v49 = vpop.permute.xlu0 %2447 }
 0x27f   : > { %v2484_v42 = vsel %vm470_vm10, %v2483_v6, %v2448_v49 }
 0x280   : > { %2705 = vmatpush1.msk.msra.mxu0 %vm953_vm11, %v2484_v42 }
 0x281   : > { %2541 = vmatprep.subr.mxu0 %v2499_v51 }
 0x282   : > { %2542 = vmatpush1.msra.mxu0 %v2498_v22 }
 0x283   : > { %2706 = vmatmul.mubr.msk.f32.vlgmr.msra.gmra.mxu0 %vm1649_vm12, %v2703_v60 }
 0x312   : > { %v1725_v20 = vpop.f32.mrf.mxu0 }
 0x314   : > { %v1727_v28 = vpop.f32.mrf.mxu0 }
 0x332   : > { %v1805_v52 = vpop.f32.mrf.mxu1 }
 0x333   : > { %v1806_v45 = vadd.f32 %v1805_v52, %v1725_v20 }
 0x334   : > { %v1807_v27 = vpop.f32.mrf.mxu1 }
 0x335   : > { %v1808_v11 = vadd.f32 %v1807_v27, %v1727_v28 }
 0x343   : > { %v2577_v50 = vpop.f32.mrf.mxu0 }
 0x344   : > { %v2582_v5 = vadd.f32 %v2577_v50, %v1806_v45 }
 0x345   : > { %v2579_v38 = vpop.f32.mrf.mxu0 }
 0x346   : > { %2584 = vst [vmem:[%s177_s11] sm:$0xff] %v2582_v5  ;;  %v2583_v17 = vadd.f32 %v2579_v38, %v1808_v11 }
 0x348   : > { %2585 = vst [vmem:[%s177_s11 + $0x8] sm:$0xff] %v2583_v17  ;;  %v2586_v48 = vadd.f32 %v2583_v17, %v2582_v5 }
 0x34a   : > { %2587 = vadd.xlane.f32.xlu0 %v2586_v48 }
 0x3d3   : > { %v2588_v10 = vpop.xlane.xlu0 %2587 }
 0x3d4   : > { %v2589_v43 = vmul.f32 0.00390625, %v2588_v10 }
 0x3d6   : > { %v2590_v33 = vsub.f32 %v2582_v5, %v2589_v43  ;;  %v2591_v2 = vsub.f32 %v2583_v17, %v2589_v43 }
 0x3d8   : > { %v2592_v53 = vmul.f32 %v2590_v33, %v2590_v33  ;;  %v2593_v32 = vmul.f32 %v2591_v2, %v2591_v2 }
 0x3da   : > { %v2594_v8 = vadd.f32 %v2593_v32, %v2592_v53 }
 0x3dc   : > { %2595 = vadd.xlane.f32.xlu1 %v2594_v8 }
 0x465   : > { %v2596_v41 = vpop.xlane.xlu1 %2595 }
 0x466   : > { %v2597_v18 = vsel %vm191_vm0, %v2588_v10, %v2596_v41 }
 0x467   : > { %2599 = vst.msk [vmem:[%s181_s17] sm:$0xff] %vm2598_vm13, %v2597_v18 }
 0x468 PF: > { %s14_s12 = sadd.s32 1, %s2766_s12  }
 0x469   : > { %p11_p4 = scmp.ge.s32.totalorder %s14_s12, 4  }
 0x46b   :  { %13 = sbr.rel (!%p11_p4) target bundleno = 1 (0x1), region = 72 }

</bundles_post_ra>
